<compile_context>
chip_gen: v6e
topology: v6e:2x2x1
jax: 0.10.0
libtpu: 0.0.40
codegen_flags: <defaults>
</compile_context>

<pallas_src>
import functools

import jax
import jax.numpy as jnp
from jax import lax
from jax.experimental import pallas as pl
from jax.experimental.pallas import tpu as pltpu

CIN, COUT = 4, 4
KH, KW = 6, 3
SH, SW = 4, 1
PH, PW = 0, 1


def _convt_sigmoid_kernel(x_ref, w_ref, b_ref, o_ref, *, N, H, W):
    # x_ref: (N, CIN, H*W)            VMEM   (lane axis = flattened H*W)
    # w_ref: (KH*COUT, KW*CIN)        VMEM   row = kh*COUT+co, col = kw*CIN+ci
    # b_ref: (2*COUT, 1)              VMEM   b tiled twice (per-row bias for an (r-pair, co) block)
    # o_ref: (N, SH*COUT, (H+1)*W)    VMEM   row = r*COUT+co, lane = q*W+ow  (de-interleaved)
    HW = H * W
    f32 = jnp.float32

    # Lane-position masks: the +/-1 shifts in the flattened H*W axis must not pull data
    # across an H-row boundary (these positions are the W-padding zeros of the conv).
    col = lax.broadcasted_iota(jnp.int32, (CIN, HW), 1) % W
    at_last = col == (W - 1)       # reading ow+1 is out of range here
    at_first = col == 0            # reading ow-1 is out of range here
    zcol = jnp.zeros((CIN, 1), f32)
    zrow = jnp.zeros((2 * COUT, W), f32)

    wmat = w_ref[...]              # (24, 12)
    bcol = b_ref[...]              # (8, 1)

    for n in range(N):             # N is tiny (1 in the spec); unrolled at trace time
        xn = x_ref[n]                                                        # (CIN, HW)
        # x[n, ci, q, ow + 1 - kw] for kw = 0, 1, 2 (zero outside the W window).
        x_m1 = jnp.where(at_last, 0.0,
                         jnp.concatenate([xn[:, 1:], zcol], axis=1))         # kw = 0
        x_p1 = jnp.where(at_first, 0.0,
                         jnp.concatenate([zcol, xn[:, :HW - 1]], axis=1))    # kw = 2
        xcat = jnp.concatenate([x_m1, xn, x_p1], axis=0)                     # (KW*CIN, HW)

        # One MXU push does the whole contraction for every (kh, co):
        #   acc[kh*COUT+co, q*W+ow] = sum_{ci,kw} w[ci,co,kh,kw] * x[n,ci,q,ow+1-kw]
        acc = jnp.dot(wmat, xcat, preferred_element_type=f32)                # (KH*COUT, HW)

        # De-interleaved epilogue.  Output row oh = SH*q + r receives
        #   acc[r*COUT+co, q]            for q < H
        # + acc[(r+SH)*COUT+co, q-1]     for q >= 1 and r < 2.
        # Flattened over (q, ow): append / prepend one W-wide zero block (lane-dense ops).
        top = (jnp.concatenate([acc[0:2 * COUT], zrow], axis=1)
               + jnp.concatenate([zrow, acc[4 * COUT:6 * COUT]], axis=1))    # r = 0, 1
        bot = jnp.concatenate([acc[2 * COUT:4 * COUT], zrow], axis=1)        # r = 2, 3
        o_ref[n, 0:2 * COUT, :] = jax.nn.sigmoid(top + bcol)
        o_ref[n, 2 * COUT:4 * COUT, :] = jax.nn.sigmoid(bot + bcol)


def conv_transpose_sigmoid(x, w, b):
    N, Cin, H, W = x.shape
    assert Cin == CIN and w.shape == (CIN, COUT, KH, KW) and b.shape == (COUT,)
    H_out = (H - 1) * SH - 2 * PH + KH
    W_out = (W - 1) * SW - 2 * PW + KW
    assert W_out == W  # holds for KW=3, SW=1, PW=1

    # Pure-bitcast / tiny prep (no data-movement kernels for x).
    x2 = x.astype(jnp.float32).reshape(N, CIN, H * W)
    wmat = w.astype(jnp.float32).transpose(2, 1, 3, 0).reshape(KH * COUT, KW * CIN)
    bcol = jnp.tile(b.astype(jnp.float32), 2).reshape(2 * COUT, 1)

    L = (H + 1) * W
    kernel = functools.partial(_convt_sigmoid_kernel, N=N, H=H, W=W)
    out = pl.pallas_call(
        kernel,
        out_shape=jax.ShapeDtypeStruct((N, SH * COUT, L), jnp.float32),
        in_specs=[
            pl.BlockSpec(memory_space=pltpu.MemorySpace.VMEM),
            pl.BlockSpec(memory_space=pltpu.MemorySpace.VMEM),
            pl.BlockSpec(memory_space=pltpu.MemorySpace.VMEM),
        ],
        out_specs=pl.BlockSpec(memory_space=pltpu.MemorySpace.VMEM),
    )(x2, wmat, bcol)

    # Layout glue: interleave (q, r) -> oh = SH*q + r and crop the SH*(H+1) rows to H_out.
    out = out.reshape(N, SH, COUT, H + 1, W)
    y = out.transpose(0, 2, 3, 1, 4).reshape(N, COUT, SH * (H + 1), W)[:, :, :H_out, :]
    return y


def _reference(x, w, b):
    # ConvTranspose2d == cross-correlation of the lhs-dilated input with the flipped,
    # io-swapped kernel, padded by k-1-p on each side.
    g = jnp.transpose(w[:, :, ::-1, ::-1], (1, 0, 2, 3))     # (COUT, CIN, KH, KW)
    y = lax.conv_general_dilated(
        x, g, window_strides=(1, 1),
        padding=((KH - 1 - PH, KH - 1 - PH), (KW - 1 - PW, KW - 1 - PW)),
        lhs_dilation=(SH, SW), rhs_dilation=(1, 1),
        dimension_numbers=("NCHW", "OIHW", "NCHW"),
        precision=lax.Precision.HIGHEST)
    return jax.nn.sigmoid(y + b.reshape(1, -1, 1, 1))


if __name__ == "__main__":
    key = jax.random.PRNGKey(0)
    kx, kw_, kb = jax.random.split(key, 3)
    N, H, W = 1, 100, 49   # matches the PyTorch spec input x1 = (1, 4, 100, 49)
    x = jax.random.normal(kx, (N, CIN, H, W), dtype=jnp.float32)
    w = jax.random.normal(kw_, (CIN, COUT, KH, KW), dtype=jnp.float32) * 0.1
    b = jax.random.normal(kb, (COUT,), dtype=jnp.float32) * 0.1

    y = jax.jit(conv_transpose_sigmoid)(x, w, b)
    y = jax.block_until_ready(y)

    expected_shape = (N, COUT, (H - 1) * SH - 2 * PH + KH, (W - 1) * SW - 2 * PW + KW)
    assert y.shape == expected_shape, (y.shape, expected_shape)

    y_ref = _reference(x, w, b)
    err = float(jnp.max(jnp.abs(y - y_ref)))
    assert err < 2e-3, err   # loose enough for MXU pass-decomposed f32 vs XLA conv

    print("KERNEL_OK")
</pallas_src>

<mosaic_0001>
module attributes {stable_mosaic.version = 11 : i64} {
  func.func @_convt_sigmoid_kernel(%arg0: memref<1x4x4900xf32, #tpu.memory_space<vmem>>, %arg1: memref<24x12xf32, #tpu.memory_space<vmem>>, %arg2: memref<8x1xf32, #tpu.memory_space<vmem>>, %arg3: memref<1x16x4949xf32, #tpu.memory_space<vmem>>) attributes {dimension_semantics = [], scalar_prefetch = 0 : i64, scratch_operands = 0 : i64, tpu.core_type = #tpu.core_type<tc>} {
    %0 = tpu.iota {dimensions = array<i32: 1>} : vector<4x4900xi32>
    %c49_i32 = arith.constant 49 : i32
    %c0_i32 = arith.constant 0 : i32
    %1 = arith.cmpi eq, %c49_i32, %c0_i32 : i32
    %c1_i32 = arith.constant 1 : i32
    %2 = arith.select %1, %c1_i32, %c49_i32 : i32
    %3 = vector.broadcast %2 : i32 to vector<4x4900xi32>
    %4 = arith.remsi %0, %3 : vector<4x4900xi32>
    %c0_i32_0 = arith.constant 0 : i32
    %5 = vector.broadcast %c0_i32_0 : i32 to vector<4x4900xi32>
    %6 = arith.cmpi ne, %4, %5 : vector<4x4900xi32>
    %c0_i32_1 = arith.constant 0 : i32
    %7 = vector.broadcast %c0_i32_1 : i32 to vector<4x4900xi32>
    %8 = arith.cmpi slt, %4, %7 : vector<4x4900xi32>
    %c0_i32_2 = arith.constant 0 : i32
    %9 = arith.cmpi slt, %2, %c0_i32_2 : i32
    %10 = vector.broadcast %9 : i1 to vector<4x4900xi1>
    %11 = vector.broadcast %10 : vector<4x4900xi1> to vector<4x4900xi1>
    %12 = arith.xori %8, %11 : vector<4x4900xi1>
    %13 = arith.andi %12, %6 : vector<4x4900xi1>
    %14 = vector.broadcast %2 : i32 to vector<4x4900xi32>
    %15 = arith.addi %4, %14 : vector<4x4900xi32>
    %16 = arith.select %13, %15, %4 : vector<4x4900xi1>, vector<4x4900xi32>
    %c48_i32 = arith.constant 48 : i32
    %17 = vector.broadcast %c48_i32 : i32 to vector<4x4900xi32>
    %18 = arith.cmpi eq, %16, %17 : vector<4x4900xi32>
    %c0_i32_3 = arith.constant 0 : i32
    %19 = vector.broadcast %c0_i32_3 : i32 to vector<4x4900xi32>
    %20 = arith.cmpi eq, %16, %19 : vector<4x4900xi32>
    %cst = arith.constant 0.000000e+00 : f32
    %21 = vector.broadcast %cst : f32 to vector<4x1xf32>
    %cst_4 = arith.constant 0.000000e+00 : f32
    %22 = vector.broadcast %cst_4 : f32 to vector<8x49xf32>
    %c0 = arith.constant 0 : index
    %c0_5 = arith.constant 0 : index
    %23 = vector.load %arg1[%c0, %c0_5] : memref<24x12xf32, #tpu.memory_space<vmem>>, vector<24x12xf32>
    %c0_6 = arith.constant 0 : index
    %c0_7 = arith.constant 0 : index
    %24 = vector.load %arg2[%c0_6, %c0_7] : memref<8x1xf32, #tpu.memory_space<vmem>>, vector<8x1xf32>
    %c0_8 = arith.constant 0 : index
    %c0_9 = arith.constant 0 : index
    %c0_10 = arith.constant 0 : index
    %25 = vector.load %arg0[%c0_8, %c0_9, %c0_10] : memref<1x4x4900xf32, #tpu.memory_space<vmem>>, vector<1x4x4900xf32>
    %26 = vector.shape_cast %25 : vector<1x4x4900xf32> to vector<4x4900xf32>
    %27 = vector.extract_strided_slice %26 {offsets = [0, 1], sizes = [4, 4899], strides = [1, 1]} : vector<4x4900xf32> to vector<4x4899xf32>
    %28 = tpu.concatenate %27, %21 in 1 : vector<4x4899xf32>, vector<4x1xf32> -> vector<4x4900xf32>
    %cst_11 = arith.constant 0.000000e+00 : f32
    %29 = vector.broadcast %cst_11 : f32 to vector<4x4900xf32>
    %30 = arith.select %18, %29, %28 : vector<4x4900xi1>, vector<4x4900xf32>
    %31 = vector.extract_strided_slice %26 {offsets = [0, 0], sizes = [4, 4899], strides = [1, 1]} : vector<4x4900xf32> to vector<4x4899xf32>
    %32 = tpu.concatenate %21, %31 in 1 : vector<4x1xf32>, vector<4x4899xf32> -> vector<4x4900xf32>
    %cst_12 = arith.constant 0.000000e+00 : f32
    %33 = vector.broadcast %cst_12 : f32 to vector<4x4900xf32>
    %34 = arith.select %20, %33, %32 : vector<4x4900xi1>, vector<4x4900xf32>
    %35 = tpu.concatenate %30, %26, %34 in 0 : vector<4x4900xf32>, vector<4x4900xf32>, vector<4x4900xf32> -> vector<12x4900xf32>
    %cst_13 = arith.constant dense<0.000000e+00> : vector<24x4900xf32>
    %36 = tpu.matmul %23, %35, %cst_13 {dimension_numbers = #tpu.dot_dimension_numbers<[1], [0], [0], [1], [0, 0, 1, 1], [], []>} : vector<24x12xf32>, vector<12x4900xf32>, vector<24x4900xf32> -> vector<24x4900xf32>
    %37 = vector.extract_strided_slice %36 {offsets = [0, 0], sizes = [8, 4900], strides = [1, 1]} : vector<24x4900xf32> to vector<8x4900xf32>
    %38 = tpu.concatenate %37, %22 in 1 : vector<8x4900xf32>, vector<8x49xf32> -> vector<8x4949xf32>
    %39 = vector.extract_strided_slice %36 {offsets = [16, 0], sizes = [8, 4900], strides = [1, 1]} : vector<24x4900xf32> to vector<8x4900xf32>
    %40 = tpu.concatenate %22, %39 in 1 : vector<8x49xf32>, vector<8x4900xf32> -> vector<8x4949xf32>
    %41 = arith.addf %38, %40 : vector<8x4949xf32>
    %42 = vector.extract_strided_slice %36 {offsets = [8, 0], sizes = [8, 4900], strides = [1, 1]} : vector<24x4900xf32> to vector<8x4900xf32>
    %43 = tpu.concatenate %42, %22 in 1 : vector<8x4900xf32>, vector<8x49xf32> -> vector<8x4949xf32>
    %44 = vector.broadcast %24 : vector<8x1xf32> to vector<8x4949xf32>
    %45 = arith.addf %41, %44 : vector<8x4949xf32>
    %46 = arith.negf %45 : vector<8x4949xf32>
    %47 = math.exp %46 : vector<8x4949xf32>
    %cst_14 = arith.constant 1.000000e+00 : f32
    %48 = vector.broadcast %cst_14 : f32 to vector<8x4949xf32>
    %49 = arith.addf %48, %47 : vector<8x4949xf32>
    %50 = arith.divf %48, %49 : vector<8x4949xf32>
    %c0_15 = arith.constant 0 : index
    %c0_16 = arith.constant 0 : index
    %c0_17 = arith.constant 0 : index
    %51 = vector.load %arg3[%c0_15, %c0_16, %c0_17] : memref<1x16x4949xf32, #tpu.memory_space<vmem>>, vector<1x8x4949xf32>
    %52 = vector.shape_cast %51 : vector<1x8x4949xf32> to vector<8x4949xf32>
    %53 = vector.shape_cast %50 : vector<8x4949xf32> to vector<1x8x4949xf32>
    tpu.vector_store %arg3[%c0_15, %c0_16, %c0_17], %53 {strides = array<i32>} : memref<1x16x4949xf32, #tpu.memory_space<vmem>>, vector<1x8x4949xf32>,
    %54 = vector.broadcast %24 : vector<8x1xf32> to vector<8x4949xf32>
    %55 = arith.addf %43, %54 : vector<8x4949xf32>
    %56 = arith.negf %55 : vector<8x4949xf32>
    %57 = math.exp %56 : vector<8x4949xf32>
    %cst_18 = arith.constant 1.000000e+00 : f32
    %58 = vector.broadcast %cst_18 : f32 to vector<8x4949xf32>
    %59 = arith.addf %58, %57 : vector<8x4949xf32>
    %60 = arith.divf %58, %59 : vector<8x4949xf32>
    %c0_19 = arith.constant 0 : index
    %c8 = arith.constant 8 : index
    %c0_20 = arith.constant 0 : index
    %61 = vector.load %arg3[%c0_19, %c8, %c0_20] : memref<1x16x4949xf32, #tpu.memory_space<vmem>>, vector<1x8x4949xf32>
    %62 = vector.shape_cast %61 : vector<1x8x4949xf32> to vector<8x4949xf32>
    %63 = vector.shape_cast %60 : vector<8x4949xf32> to vector<1x8x4949xf32>
    tpu.vector_store %arg3[%c0_19, %c8, %c0_20], %63 {strides = array<i32>} : memref<1x16x4949xf32, #tpu.memory_space<vmem>>, vector<1x8x4949xf32>,
    return
  }
}

</mosaic_0001>

<bundles_post_ra>
// kernel: tile.0
= control target key start
LH: loop header
LB: loop body
LE: loop exit
PB: predicated region body
PF: predicated region fallthrough
CT: control target
= control target key end

     0   :  { %s35_s8 = smov 125   ;;  %vm8_vm0 = vcmask 7168   ;;  %s36_s11 = smov 126   ;;  %s62_s0 = inlined_call_operand.vmem [shape: f32[2,4], index: 0, kind: input, shape index: {}]   ;;  %s63_s1 = inlined_call_operand.vmem [shape: f32[8,1], index: 1, kind: output, shape index: {}]  }
   0x1   :  { %v5_v0 = vld [vmem:[%s62_s0] sm:$0x3]  ;;  %s34_s0 = smov 127  }
   0x2   :  { %6 = vst [vmem:[#allocation0] sm:$0x3] %v5_v0 }
   0x9   :  { %v10_v1 = vld [vmem:[#allocation0] sm:$0x3]  }
   0xa   :  { %v22_v2 = vld [vmem:[#allocation0] sm:$0x3]   ;;  %11 = vrot.lane.b32.xlu0 %v10_v1, %s34_s0 }
   0xb   :  { %23 = vrot.lane.b32.xlu1 %v22_v2, %s35_s8  ;;  %v7_v3 = vld [vmem:[#allocation0] sm:$0x3]  }
   0xc   :  { %v16_v4 = vld [vmem:[#allocation0] sm:$0x3]   ;;  %9 = vst.msk [vmem:[%s63_s1] ss:$4 sm:$0x3] %vm8_vm0, %v7_v3  }
   0xe   :  { %17 = vrot.lane.b32.xlu0 %v16_v4, %s36_s11 }
  0x7c   :  { %v12_v5 = vpop.permute.xlu0 %11  }
  0x7d   :  { %v24_v6 = vpop.permute.xlu1 %23   ;;  %28 = vst.msk [vmem:[%s63_s1 + $0x1] ss:$4 sm:$0x3] %vm8_vm0, %v12_v5  }
  0x7e   :  { %30 = vst.msk [vmem:[%s63_s1 + $0x3] ss:$4 sm:$0x3] %vm8_vm0, %v24_v6  }
  0x80   :  { %v18_v7 = vpop.permute.xlu0 %17  }
  0x81   :  { %29 = vst.msk [vmem:[%s63_s1 + $0x2] ss:$4 sm:$0x3] %vm8_vm0, %v18_v7  }

// kernel: tile.8
= control target key start
LH: loop header
LB: loop body
LE: loop exit
PB: predicated region body
PF: predicated region fallthrough
CT: control target
= control target key end

     0   :  { %s22_s0 = inlined_call_operand.vmem [shape: f32[4], index: 0, kind: input, shape index: {}]   ;;  %s23_s1 = inlined_call_operand.vmem [shape: f32[2,4], index: 1, kind: output, shape index: {}]  }
   0x1   :  { %v4_v0 = vld [vmem:[%s22_s0] ss:$0 sm:$0xff] }
   0x2   :  { %5 = vst [vmem:[%s23_s1] sm:$0x3] %v4_v0 }

// kernel: conv_transpose_sigmoid.1
= control target key start
LH: loop header
LB: loop body
LE: loop exit
PB: predicated region body
PF: predicated region fallthrough
CT: control target
= control target key end

     0   :  { %s4596_s16 = smov 127   ;;  %s4597_s17 = smov 1   ;;  %v4598_v3 = vmov 0.0   ;;  %v14_v21 = vlaneseq  ;;  %vm1094_vm2 = vcmask 7168   ;;  %vm897_vm5 = vcmask 1039360   ;;  %s6979_s0 = inlined_call_operand.vmem [shape: f32[1,4,4900], index: 0, kind: input, shape index: {}]   ;;  %s6980_s1 = inlined_call_operand.vmem [shape: f32[24,12], index: 1, kind: input, shape index: {}]   ;;  %s6981_s2 = inlined_call_operand.vmem [shape: f32[8,1], index: 2, kind: input, shape index: {}]   ;;  %s6982_s3 = inlined_call_operand.vmem [shape: f32[1,16,4949], index: 3, kind: output, shape index: {}]  }
   0x1   :  { %v4625_v0 = vld [vmem:[%s6979_s0 + $0x8] sm:$0xff]  ;;  %v4630_v1 = vld [vmem:[%s6979_s0] sm:$0xff]  ;;  %1483 = vmatprep.mubr.f32.mxu0 %v4598_v3  ;;  %1566 = vmatprep.mubr.f32.mxu1 %v4598_v3  ;;  %v4653_v5 = vld [vmem:[%s6979_s0 + $0x10] sm:$0xff]  ;;  %vm1252_vm9 = vcmask 1043456  }
   0x2   :  { %823 = vrot.lane.b32.xlu1 %v4625_v0, %s4596_s16  ;;  %1016 = vrot.lane.b32.xlu0 %v4630_v1, %s4597_s17  ;;  %v800_v2 = vcombine.high %v4630_v1, %v4630_v1  ;;  %v801_v4 = vcombine.high %v4625_v0, %v4625_v0  ;;  %v802_v6 = vcombine.high %v4653_v5, %v4653_v5  ;;  %v4666_v7 = vld [vmem:[%s6979_s0 + $0x18] sm:$0xff]  ;;  %v4679_v9 = vld [vmem:[%s6979_s0 + $0x20] sm:$0xff]  ;;  %v4751_v23 = vand.u32 127, %v14_v21 }
   0x3   :  { %v803_v8 = vcombine.high %v4666_v7, %v4666_v7  ;;  %v804_v10 = vcombine.high %v4679_v9, %v4679_v9  ;;  %v4692_v11 = vld [vmem:[%s6979_s0 + $0x28] sm:$0xff]  ;;  %v4705_v13 = vld [vmem:[%s6979_s0 + $0x30] sm:$0xff]  ;;  %v4718_v15 = vld [vmem:[%s6979_s0 + $0x38] sm:$0xff]  ;;  %v1212_v61 = vcombine.low %v4630_v1, %v4630_v1 }
   0x4   :  { %v805_v12 = vcombine.high %v4692_v11, %v4692_v11  ;;  %v806_v14 = vcombine.high %v4705_v13, %v4705_v13  ;;  %v807_v16 = vcombine.high %v4718_v15, %v4718_v15  ;;  %v4731_v17 = vld [vmem:[%s6979_s0 + $0x40] sm:$0xff]  ;;  %v769_v19 = vld [vmem:[%s6979_s0 + $0x48] sm:$0xff]  ;;  %v770_v22 = vld [vmem:[%s6979_s0 + $0x50] sm:$0xff]  ;;  %v16_v25 = vadd.s32 128, %v4751_v23 }
   0x5   :  { %v808_v18 = vcombine.high %v4731_v17, %v4731_v17  ;;  %v809_v20 = vcombine.high %v769_v19, %v769_v19  ;;  %v810_v24 = vcombine.high %v770_v22, %v770_v22  ;;  %v18_v26 = vadd.s32 384, %v4751_v23  ;;  %v771_v27 = vld [vmem:[%s6979_s0 + $0x58] sm:$0xff]  ;;  %v772_v41 = vld [vmem:[%s6979_s0 + $0x60] sm:$0xff]  ;;  %v773_v56 = vld [vmem:[%s6979_s0 + $0x68] sm:$0xff] }
   0x6   :  { %821 = vrot.lane.b32.xlu1 %v800_v2, %s4596_s16  ;;  %1018 = vrot.lane.b32.xlu0 %v800_v2, %s4597_s17  ;;  %v4762_v28 = vmul.u32.u64.low 2804876602, %v16_v25  ;;  %v4763_v29 = vmul.u32.u64.high 2804876602, %v16_v25, %v4762_v28  ;;  %v4766_v30 = vmul.u32.u64.low 2804876602, %v4751_v23  ;;  %v4767_v31 = vmul.u32.u64.high 2804876602, %v4751_v23, %v4766_v30 }
   0x7   :  { %v19_v32 = vadd.s32 512, %v4751_v23  ;;  %v17_v33 = vadd.s32 256, %v4751_v23  ;;  %v811_v34 = vcombine.high %v771_v27, %v771_v27  ;;  %v4789_v43 = vadd.s32 640, %v4751_v23 }
   0x8   :  { %v4773_v35 = vmul.u32.u64.low 2804876602, %v18_v26  ;;  %v4774_v36 = vmul.u32.u64.high 2804876602, %v18_v26, %v4773_v35  ;;  %v71_v42 = vshrl.u32 %v4763_v29, 5  ;;  %v60_v44 = vshrl.u32 %v4767_v31, 5 }
   0x9   :  { %v4776_v37 = vmul.u32.u64.low 2804876602, %v19_v32  ;;  %v4777_v38 = vmul.u32.u64.high 2804876602, %v19_v32, %v4776_v37  ;;  %v4779_v39 = vmul.u32.u64.low 2804876602, %v17_v33  ;;  %v4780_v40 = vmul.u32.u64.high 2804876602, %v17_v33, %v4779_v39 }
   0xa   :  { %1020 = vrot.lane.b32.xlu1 %v4625_v0, %s4597_s17  ;;  %819 = vrot.lane.b32.xlu0 %v4630_v1, %s4596_s16  ;;  %v812_v45 = vcombine.high %v772_v41, %v772_v41  ;;  %v93_v46 = vshrl.u32 %v4774_v36, 5  ;;  %v72_v47 = vmul.u32 49, %v71_v42  ;;  %v4800_v50 = vadd.s32 768, %v4751_v23 }
   0xb   :  { %v4796_v48 = vmul.u32.u64.low 2804876602, %v4789_v43  ;;  %v4797_v49 = vmul.u32.u64.high 2804876602, %v4789_v43, %v4796_v48  ;;  %v61_v51 = vmul.u32 49, %v60_v44  ;;  %v104_v52 = vshrl.u32 %v4777_v38, 5 }
   0xc   :  { %v82_v53 = vshrl.u32 %v4780_v40, 5  ;;  %v94_v54 = vmul.u32 49, %v93_v46  ;;  %v4807_v55 = vadd.s32 896, %v4751_v23  ;;  %v73_v57 = vsub.s32 %v16_v25, %v72_v47 }
   0xd   :  { %v4813_v58 = vmul.u32.u64.low 2804876602, %v4800_v50  ;;  %v4814_v59 = vmul.u32.u64.high 2804876602, %v4800_v50, %v4813_v58  ;;  %v62_v60 = vsub.s32 %v4751_v23, %v61_v51  ;;  %v105_v62 = vmul.u32 49, %v104_v52 }
   0xe   :  { %825 = vrot.lane.b32.xlu1 %v801_v4, %s4596_s16  ;;  %1022 = vrot.lane.b32.xlu0 %v801_v4, %s4597_s17  ;;  %v83_v63 = vmul.u32 49, %v82_v53  ;;  %v813_v2 = vcombine.high %v773_v56, %v773_v56  ;;  %v95_v4 = vsub.s32 %v18_v26, %v94_v54  ;;  %vm484_vm0 = vcmp.ne.s32.totalorder %v73_v57, 0  ;;  %v4856_v26 = vld [vmem:[%s6979_s0 + $0x80] sm:$0xff] }
   0xf   :  { %vm523_vm1 = vcmp.lt.s32.totalorder %v73_v57, 0  ;;  %v4841_v21 = vadd.s32 1024, %v4751_v23  ;;  %vm483_vm3 = vcmp.ne.s32.totalorder %v62_v60, 0  ;;  %vm522_vm4 = vcmp.lt.s32.totalorder %v62_v60, 0 }
  0x10   :  { %vm4849_vm6 = vmand %vm523_vm1, %vm484_vm0  ;;  %vm486_vm7 = vcmp.ne.s32.totalorder %v95_v4, 0  ;;  %vm525_vm8 = vcmp.lt.s32.totalorder %v95_v4, 0  ;;  %v600_v28 = vadd.s32 49, %v62_v60  ;;  %v4863_v29 = vcombine.high %v4856_v26, %v4856_v26 }
  0x11   :  { %v4866_v31 = vadd.s32 1280, %v4751_v23  ;;  %vm561_vm10 = vmand %vm522_vm4, %vm483_vm3  ;;  %v4872_v35 = vmul.u32.u64.low 2804876602, %v4841_v21  ;;  %v4873_v36 = vmul.u32.u64.high 2804876602, %v4841_v21, %v4872_v35  ;;  %v1214_v47 = vcombine.low %v4653_v5, %v4653_v5 }
  0x12   :  { %1024 = vrot.lane.b32.xlu1 %v4653_v5, %s4597_s17  ;;  %827 = vrot.lane.b32.xlu0 %v4653_v5, %s4596_s16  ;;  %vm4879_vm11 = vmand %vm525_vm8, %vm486_vm7  ;;  %v4892_v42 = vsel %vm561_vm10, %v600_v28, %v62_v60  ;;  %vm1292_vm8 = vcmask 97280   ;;  %v4943_v60 = vld [vmem:[%s6979_s0 + $0x90] sm:$0xff]  ;;  %v5003_v38 = vadd.s32 1536, %v4751_v23 }
  0x13   :  { %vm678_vm7 = vcmp.eq.s32.totalorder %v4892_v42, 48 }
  0x16   :  { %829 = vrot.lane.b32.xlu1 %v802_v6, %s4596_s16  ;;  %1026 = vrot.lane.b32.xlu0 %v802_v6, %s4597_s17 }
  0x1a   :  { %1028 = vrot.lane.b32.xlu1 %v4666_v7, %s4597_s17  ;;  %831 = vrot.lane.b32.xlu0 %v4666_v7, %s4596_s16 }
  0x1e   :  { %833 = vrot.lane.b32.xlu1 %v803_v8, %s4596_s16  ;;  %1030 = vrot.lane.b32.xlu0 %v803_v8, %s4597_s17  ;;  %v4822_v6 = vmul.u32.u64.low 2804876602, %v4807_v55  ;;  %v4823_v8 = vmul.u32.u64.high 2804876602, %v4807_v55, %v4822_v6 }
  0x20   :  { %v137_v39 = vshrl.u32 %v4823_v8, 5 }
  0x22   :  { %1032 = vrot.lane.b32.xlu1 %v4679_v9, %s4597_s17  ;;  %835 = vrot.lane.b32.xlu0 %v4679_v9, %s4596_s16 }
  0x26   :  { %837 = vrot.lane.b32.xlu1 %v804_v10, %s4596_s16  ;;  %1034 = vrot.lane.b32.xlu0 %v804_v10, %s4597_s17  ;;  %v774_v10 = vld [vmem:[%s6979_s0 + $0x70] sm:$0xff] }
  0x2a   :  { %1036 = vrot.lane.b32.xlu1 %v4692_v11, %s4597_s17  ;;  %839 = vrot.lane.b32.xlu0 %v4692_v11, %s4596_s16 }
  0x2e   :  { %841 = vrot.lane.b32.xlu1 %v805_v12, %s4596_s16  ;;  %1038 = vrot.lane.b32.xlu0 %v805_v12, %s4597_s17  ;;  %v4831_v12 = vld [vmem:[%s6979_s0 + $0x78] sm:$0xff] }
  0x32   :  { %1040 = vrot.lane.b32.xlu1 %v4705_v13, %s4597_s17  ;;  %843 = vrot.lane.b32.xlu0 %v4705_v13, %s4596_s16 }
  0x36   :  { %845 = vrot.lane.b32.xlu1 %v806_v14, %s4596_s16  ;;  %1042 = vrot.lane.b32.xlu0 %v806_v14, %s4597_s17  ;;  %v1213_v14 = vcombine.low %v4625_v0, %v4625_v0 }
  0x3a   :  { %1044 = vrot.lane.b32.xlu1 %v4718_v15, %s4597_s17  ;;  %847 = vrot.lane.b32.xlu0 %v4718_v15, %s4596_s16 }
  0x3e   :  { %849 = vrot.lane.b32.xlu1 %v807_v16, %s4596_s16  ;;  %1046 = vrot.lane.b32.xlu0 %v807_v16, %s4597_s17  ;;  %v115_v16 = vshrl.u32 %v4797_v49, 5 }
  0x40   :  { %v116_v30 = vmul.u32 49, %v115_v16 }
  0x42   :  { %1048 = vrot.lane.b32.xlu1 %v4731_v17, %s4597_s17  ;;  %851 = vrot.lane.b32.xlu0 %v4731_v17, %s4596_s16  ;;  %v4900_v46 = vsub.s32 %v4789_v43, %v116_v30 }
  0x46   :  { %853 = vrot.lane.b32.xlu1 %v808_v18, %s4596_s16  ;;  %1050 = vrot.lane.b32.xlu0 %v808_v18, %s4597_s17  ;;  %v814_v18 = vcombine.high %v774_v10, %v774_v10 }
  0x4a   :  { %1052 = vrot.lane.b32.xlu1 %v769_v19, %s4597_s17  ;;  %855 = vrot.lane.b32.xlu0 %v769_v19, %s4596_s16  ;;  %v601_v19 = vadd.s32 49, %v73_v57 }
  0x4c   :  { %v640_v37 = vsel %vm4849_vm6, %v601_v19, %v73_v57  ;;  %v4930_v57 = vmul.u32.u64.low 2804876602, %v4866_v31  ;;  %v4931_v58 = vmul.u32.u64.high 2804876602, %v4866_v31, %v4930_v57  ;;  %vm717_vm6 = vcmp.eq.s32.totalorder %v4892_v42, 0 }
  0x4d   :  { %vm679_vm1 = vcmp.eq.s32.totalorder %v640_v37, 48  ;;  %vm718_vm4 = vcmp.eq.s32.totalorder %v640_v37, 0 }
  0x4e   :  { %857 = vrot.lane.b32.xlu1 %v809_v20, %s4596_s16  ;;  %1054 = vrot.lane.b32.xlu0 %v809_v20, %s4597_s17  ;;  %v4838_v20 = vcombine.high %v4831_v12, %v4831_v12 }
  0x52   :  { %1056 = vrot.lane.b32.xlu1 %v770_v22, %s4597_s17  ;;  %859 = vrot.lane.b32.xlu0 %v770_v22, %s4596_s16  ;;  %v106_v22 = vsub.s32 %v19_v32, %v105_v62  ;;  %v4599_v32 = vmov 0   ;;  %v138_v62 = vmul.u32 49, %v137_v39 }
  0x53   :  { %4227 = vset.pattern.permute.xlu0 %v4599_v32 }
  0x54   :  { %vm487_vm12 = vcmp.ne.s32.totalorder %v106_v22, 0  ;;  %vm526_vm13 = vcmp.lt.s32.totalorder %v106_v22, 0  ;;  %v604_v44 = vadd.s32 49, %v106_v22  ;;  %v4980_v30 = vsub.s32 %v4807_v55, %v138_v62 }
  0x55   :  { %vm4912_vm0 = vmand %vm526_vm13, %vm487_vm12  ;;  %vm527_vm12 = vcmp.lt.s32.totalorder %v4900_v46, 0 }
  0x56   :  { %861 = vrot.lane.b32.xlu1 %v810_v24, %s4596_s16  ;;  %1058 = vrot.lane.b32.xlu0 %v810_v24, %s4597_s17  ;;  %v4843_v24 = vsub.s32 %v17_v33, %v83_v63  ;;  %v603_v33 = vadd.s32 49, %v95_v4  ;;  %v4948_v63 = vsel %vm4912_vm0, %v604_v44, %v106_v22 }
  0x58   :  { %vm485_vm14 = vcmp.ne.s32.totalorder %v4843_v24, 0  ;;  %vm524_vm15 = vcmp.lt.s32.totalorder %v4843_v24, 0  ;;  %v4908_v51 = vsel %vm4879_vm11, %v603_v33, %v95_v4  ;;  %v602_v53 = vadd.s32 49, %v4843_v24 }
  0x59   :  { %vm4925_vm3 = vmand %vm524_vm15, %vm485_vm14  ;;  %vm720_vm10 = vcmp.eq.s32.totalorder %v4908_v51, 0  ;;  %vm488_vm11 = vcmp.ne.s32.totalorder %v4900_v46, 0  ;;  %vm681_vm13 = vcmp.eq.s32.totalorder %v4908_v51, 48 }
  0x5a   :  { %1060 = vrot.lane.b32.xlu1 %v771_v27, %s4597_s17  ;;  %863 = vrot.lane.b32.xlu0 %v771_v27, %s4596_s16  ;;  %v4859_v27 = vadd.s32 1152, %v4751_v23  ;;  %vm4997_vm0 = vmand %vm527_vm12, %vm488_vm11 }
  0x5e   :  { %865 = vrot.lane.b32.xlu1 %v811_v34, %s4596_s16  ;;  %1062 = vrot.lane.b32.xlu0 %v811_v34, %s4597_s17  ;;  %v126_v34 = vshrl.u32 %v4814_v59, 5  ;;  %v4934_v59 = vadd.s32 1408, %v4751_v23 }
  0x60   :  { %v127_v43 = vmul.u32 49, %v126_v34  ;;  %v4970_v25 = vmul.u32.u64.low 2804876602, %v4934_v59  ;;  %v4971_v28 = vmul.u32.u64.high 2804876602, %v4934_v59, %v4970_v25 }
  0x61   :  { %v5078_v25 = vld [vmem:[%s6980_s1 + $0x8] sm:$0xff] }
  0x62   :  { %1064 = vrot.lane.b32.xlu1 %v772_v41, %s4597_s17  ;;  %867 = vrot.lane.b32.xlu0 %v772_v41, %s4596_s16  ;;  %v4889_v40 = vmul.u32.u64.low 2804876602, %v4859_v27  ;;  %v4890_v41 = vmul.u32.u64.high 2804876602, %v4859_v27, %v4889_v40  ;;  %v4963_v16 = vsub.s32 %v4800_v50, %v127_v43  ;;  %v607_v43 = vadd.s32 49, %v4980_v30 }
  0x63   :  { %v170_v40 = vshrl.u32 %v4931_v58, 5 }
  0x64   :  { %v159_v32 = vshrl.u32 %v4890_v41, 5  ;;  %v5009_v41 = vadd.s32 1664, %v4751_v23 }
  0x66   :  { %869 = vrot.lane.b32.xlu1 %v812_v45, %s4596_s16  ;;  %1066 = vrot.lane.b32.xlu0 %v812_v45, %s4597_s17  ;;  %v4897_v45 = vld [vmem:[%s6979_s0 + $0x88] sm:$0xff]  ;;  %v160_v52 = vmul.u32 49, %v159_v32  ;;  %v5093_v32 = vadd.s32 1792, %v4751_v23 }
  0x67   :  { %v4919_v54 = vcombine.high %v4897_v45, %v4897_v45 }
  0x6a   :  { %1068 = vrot.lane.b32.xlu1 %v773_v56, %s4597_s17  ;;  %871 = vrot.lane.b32.xlu0 %v773_v56, %s4596_s16 }
  0x6e   :  { %873 = vrot.lane.b32.xlu1 %v813_v2, %s4596_s16  ;;  %1070 = vrot.lane.b32.xlu0 %v813_v2, %s4597_s17  ;;  %v4954_v2 = vcombine.high %v4943_v60, %v4943_v60 }
  0x72   :  { %1072 = vrot.lane.b32.xlu1 %v774_v10, %s4597_s17  ;;  %875 = vrot.lane.b32.xlu0 %v774_v10, %s4596_s16  ;;  %v4960_v10 = vsel %vm4925_vm3, %v602_v53, %v4843_v24  ;;  %vm528_vm3 = vcmp.lt.s32.totalorder %v4963_v16, 0 }
  0x73   :  { %vm680_vm14 = vcmp.eq.s32.totalorder %v4960_v10, 48  ;;  %vm719_vm15 = vcmp.eq.s32.totalorder %v4960_v10, 0 }
  0x74   :  { %v4904_v48 = vpop.permute.xlu1 %823  ;;  %v1017_v49 = vpop.permute.xlu0 %1016 }
  0x75   :  { %v1172_v8 = vsel %vm1094_vm2, 0.0, %v1017_v49 }
  0x76   :  { %877 = vrot.lane.b32.xlu1 %v814_v18, %s4596_s16  ;;  %1074 = vrot.lane.b32.xlu0 %v814_v18, %s4597_s17  ;;  %v148_v18 = vshrl.u32 %v4873_v36, 5  ;;  %v1173_v33 = vsel %vm717_vm6, 0.0, %v1172_v8  ;;  %vm529_vm6 = vcmp.lt.s32.totalorder %v4980_v30, 0  ;;  %v171_v8 = vmul.u32 49, %v170_v40 }
  0x78   :  { %v822_v4 = vpop.permute.xlu1 %821  ;;  %v1019_v6 = vpop.permute.xlu0 %1018  ;;  %v149_v37 = vmul.u32 49, %v148_v18  ;;  %v5128_v10 = vsub.s32 %v4866_v31, %v171_v8 }
  0x79   :  { %v899_v19 = vsel %vm897_vm5, %v822_v4, %v4904_v48  ;;  %v1095_v22 = vsel %vm1094_vm2, %v1017_v49, %v1019_v6  ;;  %v5020_v49 = vld [vmem:[%s6980_s1] sm:$0xff] }
  0x7a   :  { %1076 = vrot.lane.b32.xlu1 %v4831_v12, %s4597_s17  ;;  %879 = vrot.lane.b32.xlu0 %v4831_v12, %s4596_s16  ;;  %v1174_v50 = vsel %vm718_vm4, 0.0, %v1095_v22  ;;  %v978_v24 = vsel %vm679_vm1, 0.0, %v899_v19  ;;  %v605_v12 = vadd.s32 49, %v4900_v46  ;;  %vm489_vm1 = vcmp.ne.s32.totalorder %v4963_v16, 0 }
  0x7b   :  { %3948 = vmatprep.subr.msk.mxu0 %vm1252_vm9, %v1174_v50  ;;  %v1254_v34 = vsel %vm1252_vm9, %v978_v24, %v4630_v1  ;;  %vm490_vm4 = vcmp.ne.s32.totalorder %v4980_v30, 0  ;;  %vm5041_vm11 = vmand %vm528_vm3, %vm489_vm1  ;;  %v5082_v50 = vsub.s32 %v4859_v27, %v160_v52  ;;  %v1215_v24 = vcombine.low %v4666_v7, %v4666_v7 }
  0x7c   :  { %v1021_v35 = vpop.permute.xlu1 %1020  ;;  %3949 = vmatpush1.msk.msra.mxu0 %vm1252_vm9, %v1173_v33  ;;  %v820_v55 = vpop.permute.xlu0 %819  ;;  %v5031_v53 = vsel %vm4997_vm0, %v605_v12, %v4900_v46  ;;  %v5049_v46 = vmul.u32.u64.low 2804876602, %v5003_v38  ;;  %v5050_v62 = vmul.u32.u64.high 2804876602, %v5003_v38, %v5049_v46  ;;  %vm5059_vm12 = vmand %vm529_vm6, %vm490_vm4  ;;  %vm682_vm0 = vcmp.eq.s32.totalorder %v4948_v63, 48 }
  0x7d   :  { %v898_v39 = vsel %vm897_vm5, %v820_v55, %v822_v4  ;;  %1449 = vmatprep.subr.mxu0 %v1254_v34  ;;  %v1096_v58 = vsel %vm1094_vm2, %v1019_v6, %v1021_v35  ;;  %vm683_vm1 = vcmp.eq.s32.totalorder %v5031_v53, 48  ;;  %v5105_v34 = vsel %vm5059_vm12, %v607_v43, %v4980_v30  ;;  %v5124_v55 = vld [vmem:[%s6980_s1 + $0x10] sm:$0xff] }
  0x7e   :  { %v977_v44 = vsel %vm678_vm7, 0.0, %v898_v39  ;;  %881 = vrot.lane.b32.xlu1 %v4838_v20, %s4596_s16  ;;  %1078 = vrot.lane.b32.xlu0 %v4838_v20, %s4597_s17  ;;  %v606_v20 = vadd.s32 49, %v4963_v16  ;;  %vm721_vm7 = vcmp.eq.s32.totalorder %v4948_v63, 0  ;;  %vm531_vm4 = vcmp.lt.s32.totalorder %v5082_v50, 0 }
  0x7f   :  { %v1253_v42 = vsel %vm1252_vm9, %v977_v44, %v1212_v61  ;;  %v5046_v61 = vsub.s32 %v4841_v21, %v149_v37  ;;  %v5064_v21 = vmul.u32.u64.low 2804876602, %v5009_v41  ;;  %v5065_v18 = vmul.u32.u64.high 2804876602, %v5009_v41, %v5064_v21 }
  0x80   :  { %v826_v56 = vpop.permute.xlu1 %825  ;;  %1450 = vmatpush1.msra.mxu0 %v1253_v42  ;;  %v1023_v57 = vpop.permute.xlu0 %1022  ;;  %v1216_v42 = vcombine.low %v4679_v9, %v4679_v9  ;;  %vm724_vm12 = vcmp.eq.s32.totalorder %v5105_v34, 0  ;;  %v5178_v1 = vadd.s32 1920, %v4751_v23  ;;  %v610_v8 = vadd.s32 49, %v5128_v10 }
  0x81   :  { %3950 = vmatmul.mubr.msk.f32.vlgmr.msra.gmra.mxu0 %vm1292_vm8, %v5020_v49  ;;  %v1097_v4 = vsel %vm1094_vm2, %v1021_v35, %v1023_v57  ;;  %v900_v19 = vsel %vm897_vm5, %v4904_v48, %v826_v56  ;;  %v181_v48 = vshrl.u32 %v4971_v28, 5  ;;  %v5099_v28 = vsel %vm5041_vm11, %v606_v20, %v4963_v16 }
  0x82   :  { %1080 = vrot.lane.b32.xlu1 %v4856_v26, %s4597_s17  ;;  %883 = vrot.lane.b32.xlu0 %v4856_v26, %s4596_s16  ;;  %v1176_v22 = vsel %vm720_vm10, 0.0, %v1097_v4  ;;  %v1175_v26 = vsel %vm719_vm15, 0.0, %v1096_v58  ;;  %vm722_vm10 = vcmp.eq.s32.totalorder %v5031_v53, 0  ;;  %vm491_vm15 = vcmp.ne.s32.totalorder %v5046_v61, 0 }
  0x83   :  { %3953 = vmatprep.subr.msk.mxu1 %vm1252_vm9, %v1176_v22  ;;  %1489 = vmatprep.mubr.f32.mxu0 %v4598_v3  ;;  %v979_v35 = vsel %vm680_vm14, 0.0, %v900_v19  ;;  %vm530_vm3 = vcmp.lt.s32.totalorder %v5046_v61, 0  ;;  %v608_v16 = vadd.s32 49, %v5046_v61  ;;  %vm492_vm14 = vcmp.ne.s32.totalorder %v5082_v50, 0 }
  0x84   :  { %v1025_v33 = vpop.permute.xlu1 %1024  ;;  %3954 = vmatpush1.msk.msra.mxu1 %vm1252_vm9, %v1175_v26  ;;  %v828_v27 = vpop.permute.xlu0 %827  ;;  %v182_v36 = vmul.u32 49, %v181_v48  ;;  %v1255_v31 = vsel %vm1252_vm9, %v979_v35, %v1213_v14  ;;  %v192_v20 = vshrl.u32 %v5050_v62, 5  ;;  %vm723_vm6 = vcmp.eq.s32.totalorder %v5099_v28, 0  ;;  %v759_v35 = vld [vmem:[%s6981_s2] sm:$0xff] }
  0x85   :  { %v901_v12 = vsel %vm897_vm5, %v826_v56, %v828_v27  ;;  %3951 = vmatmul.mubr.msk.f32.gmra.mxu0 %vm1292_vm8, %v5078_v25  ;;  %v1098_v39 = vsel %vm1094_vm2, %v1023_v57, %v1025_v33  ;;  %v203_v14 = vshrl.u32 %v5065_v18, 5  ;;  %vm684_vm11 = vcmp.eq.s32.totalorder %v5099_v28, 48 }
  0x86   :  { %885 = vrot.lane.b32.xlu1 %v4863_v29, %s4596_s16  ;;  %1082 = vrot.lane.b32.xlu0 %v4863_v29, %s4597_s17  ;;  %v980_v30 = vsel %vm681_vm13, 0.0, %v901_v12  ;;  %v5135_v29 = vmul.u32.u64.low 2804876602, %v5093_v32  ;;  %v5136_v51 = vmul.u32.u64.high 2804876602, %v5093_v32, %v5135_v29  ;;  %vm5147_vm13 = vmand %vm530_vm3, %vm491_vm15  ;;  %vm493_vm3 = vcmp.ne.s32.totalorder %v5128_v10, 0 }
  0x87   :  { %1495 = vmatprep.mubr.f32.mxu0 %v4598_v3  ;;  %v1256_v37 = vsel %vm1252_vm9, %v980_v30, %v4625_v0  ;;  %v609_v0 = vadd.s32 49, %v5082_v50  ;;  %vm5173_vm15 = vmand %vm531_vm4, %vm492_vm14  ;;  %v5188_v46 = vsel %vm5147_vm13, %v608_v16, %v5046_v61  ;;  %v5193_v62 = vsub.s32 %v4934_v59, %v182_v36 }
  0x88   :  { %v830_v40 = vpop.permute.xlu1 %829  ;;  %1532 = vmatprep.subr.mxu1 %v1256_v37  ;;  %v1027_v44 = vpop.permute.xlu0 %1026  ;;  %v193_v21 = vmul.u32 49, %v192_v20  ;;  %v5200_v61 = vadd.s32 2048, %v4751_v23  ;;  %v204_v22 = vmul.u32 49, %v203_v14  ;;  %vm725_vm4 = vcmp.eq.s32.totalorder %v5188_v46, 0 }
  0x89   :  { %v1099_v43 = vsel %vm1094_vm2, %v1025_v33, %v1027_v44  ;;  %3952 = vmatmul.mubr.msk.f32.gmra.mxu0 %vm1292_vm8, %v5124_v55  ;;  %1533 = vmatpush1.msra.mxu1 %v1255_v31  ;;  %v902_v56 = vsel %vm897_vm5, %v828_v27, %v830_v40  ;;  %v5209_v19 = vsel %vm5173_vm15, %v609_v0, %v5082_v50  ;;  %v5222_v33 = vadd.s32 2176, %v4751_v23 }
  0x8a   :  { %1084 = vrot.lane.b32.xlu1 %v4897_v45, %s4597_s17  ;;  %887 = vrot.lane.b32.xlu0 %v4897_v45, %s4596_s16  ;;  %v1178_v57 = vsel %vm722_vm10, 0.0, %v1099_v43  ;;  %v1177_v45 = vsel %vm721_vm7, 0.0, %v1098_v39  ;;  %vm685_vm10 = vcmp.eq.s32.totalorder %v5105_v34, 48  ;;  %vm532_vm7 = vcmp.lt.s32.totalorder %v5128_v10, 0 }
  0x8b   :  { %3955 = vmatmul.mubr.msk.f32.vlgmr.msra.gmra.mxu1 %vm1292_vm8, %v5020_v49  ;;  %3958 = vmatprep.subr.msk.mxu0 %vm1252_vm9, %v1178_v57  ;;  %v981_v18 = vsel %vm682_vm0, 0.0, %v902_v56  ;;  %v5218_v48 = vmul.u32.u64.low 2804876602, %v5178_v1  ;;  %v5219_v26 = vmul.u32.u64.high 2804876602, %v5178_v1, %v5218_v48  ;;  %vm494_vm0 = vcmp.ne.s32.totalorder %v5193_v62, 0 }
  0x8c   :  { %v1029_v4 = vpop.permute.xlu1 %1028  ;;  %3959 = vmatpush1.msk.msra.mxu0 %vm1252_vm9, %v1177_v45  ;;  %v832_v6 = vpop.permute.xlu0 %831  ;;  %1572 = vmatprep.mubr.f32.mxu1 %v4598_v3  ;;  %vm533_vm14 = vcmp.lt.s32.totalorder %v5193_v62, 0  ;;  %v1257_v12 = vsel %vm1252_vm9, %v981_v18, %v1214_v47  ;;  %v5247_v16 = vsub.s32 %v5003_v38, %v193_v21  ;;  %v611_v47 = vadd.s32 49, %v5193_v62 }
  0x8d   :  { %v903_v59 = vsel %vm897_vm5, %v830_v40, %v832_v6  ;;  %1649 = vmatprep.mubr.f32.mxu0 %v4598_v3  ;;  %v5250_v30 = vmul.u32.u64.low 2804876602, %v5200_v61  ;;  %v5251_v36 = vmul.u32.u64.high 2804876602, %v5200_v61, %v5250_v30  ;;  %v1100_v37 = vsel %vm1094_vm2, %v1027_v44, %v1029_v4 }
  0x8e   :  { %889 = vrot.lane.b32.xlu1 %v4919_v54, %s4596_s16  ;;  %1086 = vrot.lane.b32.xlu0 %v4919_v54, %s4597_s17  ;;  %v982_v63 = vsel %vm683_vm1, 0.0, %v903_v59  ;;  %v214_v54 = vshrl.u32 %v5136_v51, 5  ;;  %vm5242_vm1 = vmand %vm532_vm7, %vm493_vm3  ;;  %v5259_v29 = vsub.s32 %v5009_v41, %v204_v22  ;;  %vm686_vm13 = vcmp.eq.s32.totalorder %v5188_v46, 48 }
  0x8f   :  { %3956 = vmatmul.mubr.msk.f32.gmra.mxu1 %vm1292_vm8, %v5078_v25  ;;  %v1258_v50 = vsel %vm1252_vm9, %v982_v63, %v4653_v5  ;;  %v5270_v39 = vmul.u32.u64.low 2804876602, %v5222_v33  ;;  %v5271_v40 = vmul.u32.u64.high 2804876602, %v5222_v33, %v5270_v39  ;;  %vm726_vm15 = vcmp.eq.s32.totalorder %v5209_v19, 0 }
  0x90   :  { %v834_v53 = vpop.permute.xlu1 %833  ;;  %1615 = vmatprep.subr.mxu0 %v1258_v50  ;;  %v5231_v27 = vpop.permute.xlu0 %1030  ;;  %1578 = vmatprep.mubr.f32.mxu1 %v4598_v3  ;;  %v1217_v44 = vcombine.low %v4692_v11, %v4692_v11  ;;  %v215_v31 = vmul.u32 49, %v214_v54  ;;  %v1179_v52 = vsel %vm723_vm6, 0.0, %v1100_v37  ;;  %vm495_vm3 = vcmp.ne.s32.totalorder %v5247_v16, 0 }
  0x91   :  { %v1101_v5 = vsel %vm1094_vm2, %v1029_v4, %v5231_v27  ;;  %1616 = vmatpush1.msra.mxu0 %v1257_v12  ;;  %v904_v38 = vsel %vm897_vm5, %v832_v6, %v834_v53  ;;  %vm534_vm7 = vcmp.lt.s32.totalorder %v5247_v16, 0  ;;  %v5300_v43 = vadd.s32 2304, %v4751_v23 }
  0x92   :  { %1088 = vrot.lane.b32.xlu1 %v4943_v60, %s4597_s17  ;;  %891 = vrot.lane.b32.xlu0 %v4943_v60, %s4596_s16  ;;  %v1180_v51 = vsel %vm724_vm12, 0.0, %v1101_v5  ;;  %v5281_v60 = vsel %vm5242_vm1, %v610_v8, %v5128_v10  ;;  %vm5287_vm12 = vmand %vm533_vm14, %vm494_vm0  ;;  %v983_v0 = vsel %vm684_vm11, 0.0, %v904_v38  ;;  %vm496_vm6 = vcmp.ne.s32.totalorder %v5259_v29, 0 }
  0x93   :  { %3957 = vmatmul.mubr.msk.f32.gmra.mxu1 %vm1292_vm8, %v5124_v55  ;;  %3960 = vmatmul.mubr.msk.f32.vlgmr.msra.gmra.mxu0 %vm1292_vm8, %v5020_v49  ;;  %vm535_vm0 = vcmp.lt.s32.totalorder %v5259_v29, 0  ;;  %vm687_vm11 = vcmp.eq.s32.totalorder %v5209_v19, 48  ;;  %v5319_v56 = vsel %vm5287_vm12, %v611_v47, %v5193_v62  ;;  %v225_v57 = vshrl.u32 %v5219_v26, 5 }
  0x94   :  { %3963 = vmatprep.subr.msk.mxu1 %vm1252_vm9, %v1180_v51  ;;  %v1033_v20 = vpop.permute.xlu1 %1032  ;;  %v836_v10 = vpop.permute.xlu0 %835  ;;  %1655 = vmatprep.mubr.f32.mxu0 %v4598_v3  ;;  %v612_v45 = vadd.s32 49, %v5247_v16  ;;  %v613_v62 = vadd.s32 49, %v5259_v29  ;;  %v5340_v4 = vsub.s32 %v5093_v32, %v215_v31  ;;  %v1259_v21 = vsel %vm1252_vm9, %v983_v0, %v1215_v24  ;;  %vm5352_vm1 = vmand %vm535_vm0, %vm496_vm6 }
  0x95   :  { %3964 = vmatpush1.msk.msra.mxu1 %vm1252_vm9, %v1179_v52  ;;  %v905_v14 = vsel %vm897_vm5, %v834_v53, %v836_v10  ;;  %1732 = vmatprep.mubr.f32.mxu1 %v4598_v3  ;;  %vm727_vm14 = vcmp.eq.s32.totalorder %v5281_v60, 0  ;;  %v236_v32 = vshrl.u32 %v5251_v36, 5  ;;  %v1218_v63 = vcombine.low %v4705_v13, %v4705_v13 }
  0x96   :  { %893 = vrot.lane.b32.xlu1 %v4954_v2, %s4596_s16  ;;  %1090 = vrot.lane.b32.xlu0 %v4954_v2, %s4597_s17  ;;  %v984_v28 = vsel %vm685_vm10, 0.0, %v905_v14  ;;  %v779_v2 = vld [vmem:[%s6979_s0 + $0x98] sm:$0xf]  ;;  %vm5333_vm10 = vmand %vm534_vm7, %vm495_vm3  ;;  %v5358_v59 = vmul.u32.u64.low 2804876602, %v5300_v43  ;;  %v5359_v22 = vmul.u32.u64.high 2804876602, %v5300_v43, %v5358_v59  ;;  %v5367_v48 = vadd.s32 2432, %v4751_v23 }
  0x97   :  { %3961 = vmatmul.mubr.msk.f32.gmra.mxu0 %vm1292_vm8, %v5078_v25  ;;  %v1260_v58 = vsel %vm1252_vm9, %v984_v28, %v4666_v7  ;;  %v1102_v7 = vsel %vm1094_vm2, %v5231_v27, %v1033_v20  ;;  %vm688_vm12 = vcmp.eq.s32.totalorder %v5281_v60, 48  ;;  %v226_v54 = vmul.u32 49, %v225_v57 }
  0x98   :  { %v838_v6 = vpop.permute.xlu1 %837  ;;  %1698 = vmatprep.subr.mxu1 %v1260_v58  ;;  %v1035_v8 = vpop.permute.xlu0 %1034  ;;  %1661 = vmatprep.mubr.f32.mxu0 %v4598_v3  ;;  %v247_v53 = vshrl.u32 %v5271_v40, 5  ;;  %vm728_vm3 = vcmp.eq.s32.totalorder %v5319_v56, 0  ;;  %v5384_v27 = vsel %vm5333_vm10, %v612_v45, %v5247_v16  ;;  %v5390_v12 = vsel %vm5352_vm1, %v613_v62, %v5259_v29 }
  0x99   :  { %v1103_v24 = vsel %vm1094_vm2, %v1033_v20, %v1035_v8  ;;  %1699 = vmatpush1.msra.mxu1 %v1259_v21  ;;  %v906_v26 = vsel %vm897_vm5, %v836_v10, %v838_v6  ;;  %v1181_v30 = vsel %vm725_vm4, 0.0, %v1102_v7  ;;  %vm497_vm7 = vcmp.ne.s32.totalorder %v5340_v4, 0 }
  0x9a   :  { %1092 = vrot.lane.b32.xlu1 %v779_v2, %s4597_s17  ;;  %895 = vrot.lane.b32.xlu0 %v779_v2, %s4596_s16  ;;  %v1182_v50 = vsel %vm726_vm15, 0.0, %v1103_v24  ;;  %vm689_vm15 = vcmp.eq.s32.totalorder %v5319_v56, 48  ;;  %v237_v16 = vmul.u32 49, %v236_v32  ;;  %v5401_v5 = vadd.s32 2560, %v4751_v23 }
  0x9b   :  { %3962 = vmatmul.mubr.msk.f32.gmra.mxu0 %vm1292_vm8, %v5124_v55  ;;  %3965 = vmatmul.mubr.msk.f32.vlgmr.msra.gmra.mxu1 %vm1292_vm8, %v5020_v49  ;;  %v985_v47 = vsel %vm686_vm13, 0.0, %v906_v26  ;;  %v5409_v38 = vmul.u32.u64.low 2804876602, %v5367_v48  ;;  %v5410_v51 = vmul.u32.u64.high 2804876602, %v5367_v48, %v5409_v38  ;;  %vm536_vm4 = vcmp.lt.s32.totalorder %v5340_v4, 0 }
  0x9c   :  { %3968 = vmatprep.subr.msk.mxu0 %vm1252_vm9, %v1182_v50  ;;  %v1037_v36 = vpop.permute.xlu1 %1036  ;;  %v840_v37 = vpop.permute.xlu0 %839  ;;  %1738 = vmatprep.mubr.f32.mxu1 %v4598_v3  ;;  %v5416_v40 = vsub.s32 %v5178_v1, %v226_v54  ;;  %v248_v46 = vmul.u32 49, %v247_v53  ;;  %v614_v31 = vadd.s32 49, %v5340_v4  ;;  %v1219_v52 = vcombine.low %v4718_v15, %v4718_v15  ;;  %vm5442_vm0 = vmand %vm536_vm4, %vm497_vm7 }
  0x9d   :  { %3969 = vmatpush1.msk.msra.mxu0 %vm1252_vm9, %v1181_v30  ;;  %v907_v29 = vsel %vm897_vm5, %v838_v6, %v840_v37  ;;  %1815 = vmatprep.mubr.f32.mxu0 %v4598_v3  ;;  %v5426_v19 = vadd.s32 2688, %v4751_v23  ;;  %v1104_v20 = vsel %vm1094_vm2, %v1035_v8, %v1037_v36  ;;  %v1261_v0 = vsel %vm1252_vm9, %v985_v47, %v1216_v42 }
  0x9e   :  { %v986_v39 = vsel %vm687_vm11, 0.0, %v907_v29  ;;  %3316 = vperm.xlu0 %4227, %v759_v35   ;;  %vm729_vm13 = vcmp.eq.s32.totalorder %v5384_v27, 0  ;;  %vm730_vm6 = vcmp.eq.s32.totalorder %v5390_v12, 0  ;;  %v258_v14 = vshrl.u32 %v5359_v22, 5 }
  0x9f   :  { %3966 = vmatmul.mubr.msk.f32.gmra.mxu1 %vm1292_vm8, %v5078_v25  ;;  %v1262_v41 = vsel %vm1252_vm9, %v986_v39, %v4679_v9  ;;  %v5447_v9 = vsub.s32 %v5200_v61, %v237_v16  ;;  %v5450_v42 = vmul.u32.u64.low 2804876602, %v5401_v5  ;;  %v5451_v58 = vmul.u32.u64.high 2804876602, %v5401_v5, %v5450_v42 }
  0xa0   :  { %v842_v1 = vpop.permute.xlu1 %841  ;;  %1781 = vmatprep.subr.mxu0 %v1262_v41  ;;  %v1039_v10 = vpop.permute.xlu0 %1038  ;;  %1744 = vmatprep.mubr.f32.mxu1 %v4598_v3  ;;  %vm690_vm11 = vcmp.eq.s32.totalorder %v5384_v27, 48  ;;  %vm498_vm10 = vcmp.ne.s32.totalorder %v5416_v40, 0  ;;  %v5461_v45 = vsub.s32 %v5222_v33, %v248_v46  ;;  %v1183_v61 = vsel %vm727_vm14, 0.0, %v1104_v20 }
  0xa1   :  { %v1105_v28 = vsel %vm1094_vm2, %v1037_v36, %v1039_v10  ;;  %1782 = vmatpush1.msra.mxu0 %v1261_v0  ;;  %v908_v2 = vsel %vm897_vm5, %v840_v37, %v842_v1  ;;  %vm537_vm1 = vcmp.lt.s32.totalorder %v5416_v40, 0  ;;  %v5478_v33 = vsel %vm5442_vm0, %v614_v31, %v5340_v4 }
  0xa2   :  { %v1184_v34 = vsel %vm728_vm3, 0.0, %v1105_v28  ;;  %3970 = vmatmul.mubr.msk.f32.vlgmr.msra.gmra.mxu0 %vm1292_vm8, %v5020_v49  ;;  %v5470_v62 = vmul.u32.u64.low 2804876602, %v5426_v19  ;;  %v5471_v6 = vmul.u32.u64.high 2804876602, %v5426_v19, %v5470_v62  ;;  %vm691_vm14 = vcmp.eq.s32.totalorder %v5390_v12, 48  ;;  %vm5496_vm7 = vmand %vm537_vm1, %vm498_vm10 }
  0xa3   :  { %3967 = vmatmul.mubr.msk.f32.gmra.mxu1 %vm1292_vm8, %v5124_v55  ;;  %3973 = vmatprep.subr.msk.mxu1 %vm1252_vm9, %v1184_v34  ;;  %v615_v18 = vadd.s32 49, %v5416_v40  ;;  %v259_v32 = vmul.u32 49, %v258_v14  ;;  %v987_v59 = vsel %vm688_vm12, 0.0, %v908_v2  ;;  %vm499_vm3 = vcmp.ne.s32.totalorder %v5447_v9, 0  ;;  %v4579_v34 = vld [vmem:[%s6979_s0 + $0x30] sm:$0xff] }
  0xa4   :  { %v1041_v8 = vpop.permute.xlu1 %1040  ;;  %3974 = vmatpush1.msk.msra.mxu1 %vm1252_vm9, %v1183_v61  ;;  %v844_v21 = vpop.permute.xlu0 %843  ;;  %1821 = vmatprep.mubr.f32.mxu0 %v4598_v3  ;;  %v269_v7 = vshrl.u32 %v5410_v51, 5  ;;  %vm500_vm12 = vcmp.ne.s32.totalorder %v5461_v45, 0  ;;  %vm539_vm4 = vcmp.lt.s32.totalorder %v5461_v45, 0  ;;  %v5503_v24 = vadd.s32 2816, %v4751_v23 }
  0xa5   :  { %v909_v22 = vsel %vm897_vm5, %v842_v1, %v844_v21  ;;  %1898 = vmatprep.mubr.f32.mxu1 %v4598_v3  ;;  %v616_v26 = vadd.s32 49, %v5447_v9  ;;  %v5511_v50 = vadd.s32 2944, %v4751_v23  ;;  %v1106_v54 = vsel %vm1094_vm2, %v1039_v10, %v1041_v8  ;;  %vm5533_vm10 = vmand %vm539_vm4, %vm500_vm12 }
  0xa6   :  { %v988_v4 = vsel %vm689_vm15, 0.0, %v909_v22  ;;  %3971 = vmatmul.mubr.msk.f32.gmra.mxu0 %vm1292_vm8, %v5078_v25  ;;  %vm538_vm15 = vcmp.lt.s32.totalorder %v5447_v9, 0  ;;  %v1263_v30 = vsel %vm1252_vm9, %v987_v59, %v1217_v44  ;;  %vm731_vm0 = vcmp.eq.s32.totalorder %v5478_v33, 0 }
  0xa7   :  { %v1264_v56 = vsel %vm1252_vm9, %v988_v4, %v4692_v11  ;;  %1827 = vmatprep.mubr.f32.mxu0 %v4598_v3  ;;  %v617_v36 = vadd.s32 49, %v5461_v45  ;;  %v5521_v37 = vsub.s32 %v5300_v43, %v259_v32  ;;  %v5527_v47 = vsel %vm5496_vm7, %v615_v18, %v5416_v40  ;;  %vm5549_vm1 = vmand %vm538_vm15, %vm499_vm3 }
  0xa8   :  { %v846_v53 = vpop.permute.xlu1 %845  ;;  %1864 = vmatprep.subr.mxu1 %v1264_v56  ;;  %v1043_v35 = vpop.permute.xlu0 %1042  ;;  %v270_v44 = vmul.u32 49, %v269_v7  ;;  %v280_v43 = vshrl.u32 %v5451_v58, 5  ;;  %v5554_v39 = vmul.u32.u64.low 2804876602, %v5503_v24  ;;  %v5555_v40 = vmul.u32.u64.high 2804876602, %v5503_v24, %v5554_v39 }
  0xa9   :  { %v1107_v16 = vsel %vm1094_vm2, %v1041_v8, %v1043_v35  ;;  %1865 = vmatpush1.msra.mxu1 %v1263_v30  ;;  %v910_v29 = vsel %vm897_vm5, %v844_v21, %v846_v53  ;;  %v1185_v46 = vsel %vm729_vm13, 0.0, %v1106_v54  ;;  %v291_v41 = vshrl.u32 %v5471_v6, 5 }
  0xaa   :  { %v1186_v38 = vsel %vm730_vm6, 0.0, %v1107_v16  ;;  %3972 = vmatmul.mubr.msk.f32.gmra.mxu0 %vm1292_vm8, %v5124_v55  ;;  %3975 = vmatmul.mubr.msk.f32.vlgmr.msra.gmra.mxu1 %vm1292_vm8, %v5020_v49  ;;  %v5563_v31 = vmul.u32.u64.low 2804876602, %v5511_v50  ;;  %v5564_v20 = vmul.u32.u64.high 2804876602, %v5511_v50, %v5563_v31  ;;  %vm692_vm6 = vcmp.eq.s32.totalorder %v5478_v33, 48 }
  0xab   :  { %3978 = vmatprep.subr.msk.mxu0 %vm1252_vm9, %v1186_v38  ;;  %1904 = vmatprep.mubr.f32.mxu1 %v4598_v3  ;;  %vm732_vm3 = vcmp.eq.s32.totalorder %v5527_v47, 0  ;;  %v5573_v0 = vsel %vm5533_vm10, %v617_v36, %v5461_v45  ;;  %v1220_v14 = vcombine.low %v4731_v17, %v4731_v17  ;;  %v989_v28 = vsel %vm690_vm11, 0.0, %v910_v29  ;;  %v5981_v17 = vld [vmem:[%s6980_s1] sm:$0xff] }
  0xac   :  { %v1045_v1 = vpop.permute.xlu1 %1044  ;;  %3979 = vmatpush1.msk.msra.mxu0 %vm1252_vm9, %v1185_v46  ;;  %v848_v10 = vpop.permute.xlu0 %847  ;;  %1981 = vmatprep.mubr.f32.mxu0 %v4598_v3  ;;  %v5583_v42 = vsel %vm5549_vm1, %v616_v26, %v5447_v9  ;;  %v281_v58 = vmul.u32 49, %v280_v43  ;;  %vm501_vm13 = vcmp.ne.s32.totalorder %v5521_v37, 0  ;;  %vm540_vm7 = vcmp.lt.s32.totalorder %v5521_v37, 0 }
  0xad   :  { %v911_v57 = vsel %vm897_vm5, %v846_v53, %v848_v10  ;;  %v5592_v27 = vsub.s32 %v5367_v48, %v270_v44  ;;  %vm693_vm11 = vcmp.eq.s32.totalorder %v5527_v47, 48  ;;  %v292_v12 = vmul.u32 49, %v291_v41  ;;  %vm5616_vm4 = vmand %vm540_vm7, %vm501_vm13  ;;  %v4581_v47 = vld [vmem:[%s6979_s0 + $0x38] sm:$0xff] }
  0xae   :  { %v990_v2 = vsel %vm691_vm14, 0.0, %v911_v57  ;;  %3976 = vmatmul.mubr.msk.f32.gmra.mxu1 %vm1292_vm8, %v5078_v25  ;;  %vm734_vm14 = vcmp.eq.s32.totalorder %v5573_v0, 0  ;;  %v1108_v45 = vsel %vm1094_vm2, %v1043_v35, %v1045_v1  ;;  %v1265_v48 = vsel %vm1252_vm9, %v989_v28, %v1218_v63  ;;  %v5626_v63 = vld [vmem:[%s6979_s0 + $0x48] sm:$0xff] }
  0xaf   :  { %v1266_v9 = vsel %vm1252_vm9, %v990_v2, %v4579_v34  ;;  %1910 = vmatprep.mubr.f32.mxu1 %v4598_v3  ;;  %vm733_vm12 = vcmp.eq.s32.totalorder %v5583_v42, 0  ;;  %v618_v6 = vadd.s32 49, %v5521_v37  ;;  %v5609_v8 = vadd.s32 3072, %v4751_v23 }
  0xb0   :  { %v850_v61 = vpop.permute.xlu1 %849  ;;  %1947 = vmatprep.subr.mxu0 %v1266_v9  ;;  %v1047_v62 = vpop.permute.xlu0 %1046  ;;  %v5621_v13 = vsub.s32 %v5401_v5, %v281_v58  ;;  %v1221_v32 = vcombine.low %v5626_v63, %v5626_v63  ;;  %v5631_v59 = vadd.s32 3200, %v4751_v23  ;;  %vm694_vm15 = vcmp.eq.s32.totalorder %v5583_v42, 48 }
  0xb1   :  { %v1109_v21 = vsel %vm1094_vm2, %v1045_v1, %v1047_v62  ;;  %1948 = vmatpush1.msra.mxu0 %v1265_v48  ;;  %v912_v22 = vsel %vm897_vm5, %v848_v10, %v850_v61  ;;  %vm502_vm10 = vcmp.ne.s32.totalorder %v5592_v27, 0  ;;  %v302_v5 = vshrl.u32 %v5555_v40, 5 }
  0xb2   :  { %v1188_v7 = vsel %vm732_vm3, 0.0, %v1109_v21  ;;  %3977 = vmatmul.mubr.msk.f32.gmra.mxu1 %vm1292_vm8, %v5124_v55  ;;  %3980 = vmatmul.mubr.msk.f32.vlgmr.msra.gmra.mxu0 %vm1292_vm8, %v5020_v49  ;;  %v1187_v4 = vsel %vm731_vm0, 0.0, %v1108_v45  ;;  %vm695_vm1 = vcmp.eq.s32.totalorder %v5573_v0, 48  ;;  %vm541_vm3 = vcmp.lt.s32.totalorder %v5592_v27, 0  ;;  %v4583_v0 = vld [vmem:[%s6979_s0 + $0x40] sm:$0xff] }
  0xb3   :  { %3983 = vmatprep.subr.msk.mxu1 %vm1252_vm9, %v1188_v7  ;;  %1987 = vmatprep.mubr.f32.mxu0 %v4598_v3  ;;  %v5650_v60 = vsub.s32 %v5426_v19, %v292_v12  ;;  %v313_v56 = vshrl.u32 %v5564_v20, 5  ;;  %v5658_v53 = vsel %vm5616_vm4, %v618_v6, %v5521_v37  ;;  %v619_v35 = vadd.s32 49, %v5592_v27  ;;  %vm5680_vm0 = vmand %vm541_vm3, %vm502_vm10 }
  0xb4   :  { %v1049_v26 = vpop.permute.xlu1 %1048  ;;  %3984 = vmatpush1.msk.msra.mxu1 %vm1252_vm9, %v1187_v4  ;;  %v852_v54 = vpop.permute.xlu0 %851  ;;  %2064 = vmatprep.mubr.f32.mxu1 %v4598_v3  ;;  %v5662_v30 = vmul.u32.u64.low 2804876602, %v5609_v8  ;;  %v5663_v36 = vmul.u32.u64.high 2804876602, %v5609_v8, %v5662_v30  ;;  %v991_v19 = vsel %vm692_vm6, 0.0, %v912_v22  ;;  %vm503_vm6 = vcmp.ne.s32.totalorder %v5621_v13, 0 }
  0xb5   :  { %v913_v16 = vsel %vm897_vm5, %v850_v61, %v852_v54  ;;  %v5669_v11 = vmul.u32.u64.low 2804876602, %v5631_v59  ;;  %v5670_v44 = vmul.u32.u64.high 2804876602, %v5631_v59, %v5669_v11  ;;  %vm542_vm13 = vcmp.lt.s32.totalorder %v5621_v13, 0  ;;  %v5756_v61 = vld [vmem:[%s6979_s0 + $0x50] sm:$0xff] }
  0xb6   :  { %v992_v43 = vsel %vm693_vm11, 0.0, %v913_v16  ;;  %3981 = vmatmul.mubr.msk.f32.gmra.mxu0 %vm1292_vm8, %v5078_v25  ;;  %v303_v33 = vmul.u32 49, %v302_v5  ;;  %vm504_vm7 = vcmp.ne.s32.totalorder %v5650_v60, 0  ;;  %v314_v38 = vmul.u32 49, %v313_v56  ;;  %vm5724_vm3 = vmand %vm542_vm13, %vm503_vm6 }
  0xb7   :  { %v1268_v29 = vsel %vm1252_vm9, %v992_v43, %v4581_v47  ;;  %1993 = vmatprep.mubr.f32.mxu0 %v4598_v3  ;;  %v5693_v51 = vadd.s32 3328, %v4751_v23  ;;  %v1110_v39 = vsel %vm1094_vm2, %v1047_v62, %v1049_v26  ;;  %v1267_v41 = vsel %vm1252_vm9, %v991_v19, %v1219_v52 }
  0xb8   :  { %v854_v40 = vpop.permute.xlu1 %853  ;;  %2030 = vmatprep.subr.mxu1 %v1268_v29  ;;  %v1051_v46 = vpop.permute.xlu0 %1050  ;;  %vm543_vm11 = vcmp.lt.s32.totalorder %v5650_v60, 0  ;;  %v5702_v31 = vadd.s32 3456, %v4751_v23  ;;  %vm735_vm4 = vcmp.eq.s32.totalorder %v5658_v53, 0  ;;  %v5709_v1 = vsel %vm5680_vm0, %v619_v35, %v5592_v27 }
  0xb9   :  { %v1111_v20 = vsel %vm1094_vm2, %v1049_v26, %v1051_v46  ;;  %2031 = vmatpush1.msra.mxu1 %v1267_v41  ;;  %v620_v10 = vadd.s32 49, %v5621_v13  ;;  %v914_v15 = vsel %vm897_vm5, %v852_v54, %v854_v40  ;;  %vm696_vm10 = vcmp.eq.s32.totalorder %v5658_v53, 48 }
  0xba   :  { %v1190_v52 = vsel %vm734_vm14, 0.0, %v1111_v20  ;;  %3982 = vmatmul.mubr.msk.f32.gmra.mxu0 %vm1292_vm8, %v5124_v55  ;;  %3985 = vmatmul.mubr.msk.f32.vlgmr.msra.gmra.mxu1 %vm1292_vm8, %v5020_v49  ;;  %v621_v57 = vadd.s32 49, %v5650_v60  ;;  %v5730_v58 = vsub.s32 %v5503_v24, %v303_v33  ;;  %v1189_v2 = vsel %vm733_vm12, 0.0, %v1110_v39  ;;  %vm5740_vm14 = vmand %vm543_vm11, %vm504_vm7 }
  0xbb   :  { %3988 = vmatprep.subr.msk.mxu0 %vm1252_vm9, %v1190_v52  ;;  %2070 = vmatprep.mubr.f32.mxu1 %v4598_v3  ;;  %v5745_v34 = vsub.s32 %v5511_v50, %v314_v38  ;;  %v5748_v24 = vmul.u32.u64.low 2804876602, %v5693_v51  ;;  %v5749_v9 = vmul.u32.u64.high 2804876602, %v5693_v51, %v5748_v24  ;;  %v1222_v62 = vcombine.low %v5756_v61, %v5756_v61 }
  0xbc   :  { %v1053_v12 = vpop.permute.xlu1 %1052  ;;  %3989 = vmatpush1.msk.msra.mxu0 %vm1252_vm9, %v1189_v2  ;;  %v856_v45 = vpop.permute.xlu0 %855  ;;  %2147 = vmatprep.mubr.f32.mxu0 %v4598_v3  ;;  %v324_v50 = vshrl.u32 %v5663_v36, 5  ;;  %v5762_v48 = vmul.u32.u64.low 2804876602, %v5702_v31  ;;  %v5763_v6 = vmul.u32.u64.high 2804876602, %v5702_v31, %v5762_v48  ;;  %v993_v21 = vsel %vm694_vm15, 0.0, %v914_v15 }
  0xbd   :  { %v915_v18 = vsel %vm897_vm5, %v854_v40, %v856_v45  ;;  %v335_v22 = vshrl.u32 %v5670_v44, 5  ;;  %v5770_v7 = vadd.s32 3584, %v4751_v23  ;;  %vm736_vm12 = vcmp.eq.s32.totalorder %v5709_v1, 0 }
  0xbe   :  { %v994_v5 = vsel %vm695_vm1, 0.0, %v915_v18  ;;  %3986 = vmatmul.mubr.msk.f32.gmra.mxu1 %vm1292_vm8, %v5078_v25  ;;  %v5780_v42 = vsel %vm5724_vm3, %v620_v10, %v5621_v13  ;;  %v5785_v4 = vsel %vm5740_vm14, %v621_v57, %v5650_v60  ;;  %vm505_vm15 = vcmp.ne.s32.totalorder %v5730_v58, 0 }
  0xbf   :  { %v1270_v56 = vsel %vm1252_vm9, %v994_v5, %v4583_v0  ;;  %2076 = vmatprep.mubr.f32.mxu1 %v4598_v3  ;;  %vm544_vm1 = vcmp.lt.s32.totalorder %v5730_v58, 0  ;;  %vm506_vm0 = vcmp.ne.s32.totalorder %v5745_v34, 0  ;;  %v1112_v13 = vsel %vm1094_vm2, %v1051_v46, %v1053_v12 }
  0xc0   :  { %v858_v26 = vpop.permute.xlu1 %857  ;;  %2113 = vmatprep.subr.mxu0 %v1270_v56  ;;  %v1055_v60 = vpop.permute.xlu0 %1054  ;;  %v1269_v54 = vsel %vm1252_vm9, %v993_v21, %v1220_v14  ;;  %vm545_vm6 = vcmp.lt.s32.totalorder %v5745_v34, 0  ;;  %v325_v35 = vmul.u32 49, %v324_v50  ;;  %v336_v36 = vmul.u32 49, %v335_v22  ;;  %vm5817_vm13 = vmand %vm544_vm1, %vm505_vm15 }
  0xc1   :  { %v1113_v30 = vsel %vm1094_vm2, %v1053_v12, %v1055_v60  ;;  %2114 = vmatpush1.msra.mxu0 %v1269_v54  ;;  %v5803_v19 = vmul.u32.u64.low 2804876602, %v5770_v7  ;;  %v5804_v16 = vmul.u32.u64.high 2804876602, %v5770_v7, %v5803_v19  ;;  %v916_v11 = vsel %vm897_vm5, %v856_v45, %v858_v26  ;;  %vm5832_vm11 = vmand %vm545_vm6, %vm506_vm0 }
  0xc2   :  { %v1192_v44 = vsel %vm736_vm12, 0.0, %v1113_v30  ;;  %3987 = vmatmul.mubr.msk.f32.gmra.mxu1 %vm1292_vm8, %v5124_v55  ;;  %3990 = vmatmul.mubr.msk.f32.vlgmr.msra.gmra.mxu0 %vm1292_vm8, %v5020_v49  ;;  %v622_v14 = vadd.s32 49, %v5730_v58  ;;  %v623_v43 = vadd.s32 49, %v5745_v34  ;;  %v1191_v37 = vsel %vm735_vm4, 0.0, %v1112_v13 }
  0xc3   :  { %3993 = vmatprep.subr.msk.mxu1 %vm1252_vm9, %v1192_v44  ;;  %vm697_vm7 = vcmp.eq.s32.totalorder %v5709_v1, 48  ;;  %2153 = vmatprep.mubr.f32.mxu0 %v4598_v3  ;;  %v346_v47 = vshrl.u32 %v5749_v9, 5  ;;  %v5838_v29 = vadd.s32 3712, %v4751_v23  ;;  %vm737_vm4 = vcmp.eq.s32.totalorder %v5780_v42, 0 }
  0xc4   :  { %v1057_v38 = vpop.permute.xlu1 %1056  ;;  %3994 = vmatpush1.msk.msra.mxu1 %vm1252_vm9, %v1191_v37  ;;  %v860_v39 = vpop.permute.xlu0 %859  ;;  %vm698_vm3 = vcmp.eq.s32.totalorder %v5780_v42, 48  ;;  %vm738_vm14 = vcmp.eq.s32.totalorder %v5785_v4, 0  ;;  %2230 = vmatprep.mubr.f32.mxu1 %v4598_v3  ;;  %v5846_v40 = vsub.s32 %v5609_v8, %v325_v35  ;;  %v995_v46 = vsel %vm696_vm10, 0.0, %v916_v11 }
  0xc5   :  { %v917_v41 = vsel %vm897_vm5, %v858_v26, %v860_v39  ;;  %v5852_v20 = vsub.s32 %v5631_v59, %v336_v36  ;;  %v357_v10 = vshrl.u32 %v5763_v6, 5  ;;  %v5862_v8 = vsel %vm5817_vm13, %v622_v14, %v5730_v58  ;;  %v6075_v6 = vld [vmem:[%s6980_s1 + $0x10] sm:$0xff] }
  0xc6   :  { %v996_v15 = vsel %vm697_vm7, 0.0, %v917_v41  ;;  %3991 = vmatmul.mubr.msk.f32.gmra.mxu0 %vm1292_vm8, %v5078_v25  ;;  %vm699_vm10 = vcmp.eq.s32.totalorder %v5785_v4, 48  ;;  %v5868_v59 = vsel %vm5832_vm11, %v623_v43, %v5745_v34  ;;  %v347_v1 = vmul.u32 49, %v346_v47 }
  0xc7   :  { %v1272_v53 = vsel %vm1252_vm9, %v996_v15, %v5626_v63  ;;  %2159 = vmatprep.mubr.f32.mxu0 %v4598_v3  ;;  %v5874_v52 = vmul.u32.u64.low 2804876602, %v5838_v29  ;;  %v5875_v28 = vmul.u32.u64.high 2804876602, %v5838_v29, %v5874_v52  ;;  %v1114_v57 = vsel %vm1094_vm2, %v1055_v60, %v1057_v38 }
  0xc8   :  { %v862_v58 = vpop.permute.xlu1 %861  ;;  %2196 = vmatprep.subr.mxu1 %v1272_v53  ;;  %v1059_v2 = vpop.permute.xlu0 %1058  ;;  %v1271_v27 = vsel %vm1252_vm9, %v995_v46, %v1221_v32  ;;  %vm507_vm12 = vcmp.ne.s32.totalorder %v5846_v40, 0  ;;  %vm546_vm15 = vcmp.lt.s32.totalorder %v5846_v40, 0  ;;  %vm508_vm1 = vcmp.ne.s32.totalorder %v5852_v20, 0 }
  0xc9   :  { %v1115_v34 = vsel %vm1094_vm2, %v1057_v38, %v1059_v2  ;;  %2197 = vmatpush1.msra.mxu1 %v1271_v27  ;;  %v358_v24 = vmul.u32 49, %v357_v10  ;;  %v368_v9 = vshrl.u32 %v5804_v16, 5  ;;  %v918_v12 = vsel %vm897_vm5, %v860_v39, %v862_v58  ;;  %vm5914_vm11 = vmand %vm546_vm15, %vm507_vm12  ;;  %v4585_v39 = vld [vmem:[%s6979_s0 + $0x58] sm:$0xff] }
  0xca   :  { %v1194_v45 = vsel %vm738_vm14, 0.0, %v1115_v34  ;;  %3992 = vmatmul.mubr.msk.f32.gmra.mxu0 %vm1292_vm8, %v5124_v55  ;;  %3995 = vmatmul.mubr.msk.f32.vlgmr.msra.gmra.mxu1 %vm1292_vm8, %v5020_v49  ;;  %vm547_vm0 = vcmp.lt.s32.totalorder %v5852_v20, 0  ;;  %v5896_v63 = vadd.s32 3840, %v4751_v23  ;;  %v1193_v32 = vsel %vm737_vm4, 0.0, %v1114_v57 }
  0xcb   :  { %3998 = vmatprep.subr.msk.mxu0 %vm1252_vm9, %v1194_v45  ;;  %vm739_vm6 = vcmp.eq.s32.totalorder %v5862_v8, 0  ;;  %2236 = vmatprep.mubr.f32.mxu1 %v4598_v3  ;;  %vm700_vm13 = vcmp.eq.s32.totalorder %v5862_v8, 48  ;;  %v5905_v50 = vsub.s32 %v5693_v51, %v347_v1  ;;  %vm740_vm7 = vcmp.eq.s32.totalorder %v5868_v59, 0  ;;  %vm5928_vm14 = vmand %vm547_vm0, %vm508_vm1  ;;  %v6029_v1 = vld [vmem:[%s6980_s1 + $0x8] sm:$0xff] }
  0xcc   :  { %v1061_v49 = vpop.permute.xlu1 %1060  ;;  %3999 = vmatpush1.msk.msra.mxu0 %vm1252_vm9, %v1193_v32  ;;  %v864_v48 = vpop.permute.xlu0 %863  ;;  %2313 = vmatprep.mubr.f32.mxu0 %v4598_v3  ;;  %v624_v21 = vadd.s32 49, %v5846_v40  ;;  %vm701_vm4 = vcmp.eq.s32.totalorder %v5868_v59, 48  ;;  %v625_v51 = vadd.s32 49, %v5852_v20  ;;  %v997_v18 = vsel %vm698_vm3, 0.0, %v918_v12  ;;  %v4587_v32 = vld [vmem:[%s6979_s0 + $0x60] sm:$0xff] }
  0xcd   :  { %v919_v22 = vsel %vm897_vm5, %v862_v58, %v864_v48  ;;  %v5933_v0 = vsub.s32 %v5702_v31, %v358_v24  ;;  %v369_v56 = vmul.u32 49, %v368_v9  ;;  %v5944_v60 = vadd.s32 3968, %v4751_v23 }
  0xce   :  { %v998_v13 = vsel %vm699_vm10, 0.0, %v919_v22  ;;  %3996 = vmatmul.mubr.msk.f32.gmra.mxu1 %vm1292_vm8, %v5078_v25  ;;  %v5940_v42 = vmul.u32.u64.low 2804876602, %v5896_v63  ;;  %v5941_v26 = vmul.u32.u64.high 2804876602, %v5896_v63, %v5940_v42  ;;  %vm509_vm3 = vcmp.ne.s32.totalorder %v5905_v50, 0 }
  0xcf   :  { %v1274_v54 = vsel %vm1252_vm9, %v998_v13, %v5756_v61  ;;  %2242 = vmatprep.mubr.f32.mxu1 %v4598_v3  ;;  %vm548_vm12 = vcmp.lt.s32.totalorder %v5905_v50, 0  ;;  %v379_v31 = vshrl.u32 %v5875_v28, 5  ;;  %v1116_v25 = vsel %vm1094_vm2, %v1059_v2, %v1061_v49  ;;  %v6105_v13 = vld [vmem:[%s6979_s0 + $0x68] sm:$0xff] }
  0xd0   :  { %v866_v4 = vpop.permute.xlu1 %865  ;;  %2279 = vmatprep.subr.mxu0 %v1274_v54  ;;  %v1063_v35 = vpop.permute.xlu0 %1062  ;;  %v1273_v30 = vsel %vm1252_vm9, %v997_v18, %v1222_v62  ;;  %v5960_v36 = vsel %vm5914_vm11, %v624_v21, %v5846_v40  ;;  %v5965_v19 = vsel %vm5928_vm14, %v625_v51, %v5852_v20  ;;  %v626_v11 = vadd.s32 49, %v5905_v50  ;;  %vm5989_vm15 = vmand %vm548_vm12, %vm509_vm3 }
  0xd1   :  { %v1117_v16 = vsel %vm1094_vm2, %v1061_v49, %v1063_v35  ;;  %2280 = vmatpush1.msra.mxu0 %v1273_v30  ;;  %vm510_vm10 = vcmp.ne.s32.totalorder %v5933_v0, 0  ;;  %v5971_v61 = vsub.s32 %v5770_v7, %v369_v56  ;;  %v920_v62 = vsel %vm897_vm5, %v864_v48, %v866_v4 }
  0xd2   :  { %v1196_v44 = vsel %vm740_vm7, 0.0, %v1117_v16  ;;  %3997 = vmatmul.mubr.msk.f32.gmra.mxu1 %vm1292_vm8, %v5124_v55  ;;  %4000 = vmatmul.mubr.msk.f32.vlgmr.msra.gmra.mxu0 %vm1292_vm8, %v5981_v17  ;;  %v5994_v14 = vmul.u32.u64.low 2804876602, %v5944_v60  ;;  %v5995_v43 = vmul.u32.u64.high 2804876602, %v5944_v60, %v5994_v14  ;;  %v1195_v55 = vsel %vm739_vm6, 0.0, %v1116_v25 }
  0xd3   :  { %4003 = vmatprep.subr.msk.mxu1 %vm1252_vm9, %v1196_v44  ;;  %2319 = vmatprep.mubr.f32.mxu0 %v4598_v3  ;;  %vm549_vm1 = vcmp.lt.s32.totalorder %v5933_v0, 0  ;;  %v380_v37 = vmul.u32 49, %v379_v31  ;;  %v6003_v33 = vadd.s32 4096, %v4751_v23  ;;  %vm741_vm0 = vcmp.eq.s32.totalorder %v5960_v36, 0 }
  0xd4   :  { %v1065_v47 = vpop.permute.xlu1 %1064  ;;  %4004 = vmatpush1.msk.msra.mxu1 %vm1252_vm9, %v1195_v55  ;;  %v868_v38 = vpop.permute.xlu0 %867  ;;  %vm742_vm7 = vcmp.eq.s32.totalorder %v5965_v19, 0  ;;  %v1223_v40 = vcombine.low %v4585_v39, %v4585_v39  ;;  %2396 = vmatprep.mubr.f32.mxu1 %v4598_v3  ;;  %v6013_v46 = vadd.s32 4224, %v4751_v23  ;;  %v999_v41 = vsel %vm700_vm13, 0.0, %v920_v62  ;;  %vm6037_vm6 = vmand %vm549_vm1, %vm510_vm10 }
  0xd5   :  { %v921_v20 = vsel %vm897_vm5, %v866_v4, %v868_v38  ;;  %v6021_v10 = vsel %vm5989_vm15, %v626_v11, %v5905_v50  ;;  %v627_v15 = vadd.s32 49, %v5933_v0  ;;  %vm511_vm13 = vcmp.ne.s32.totalorder %v5971_v61, 0 }
  0xd6   :  { %v1000_v53 = vsel %vm701_vm4, 0.0, %v921_v20  ;;  %4001 = vmatmul.mubr.msk.f32.gmra.mxu0 %vm1292_vm8, %v6029_v1  ;;  %vm550_vm11 = vcmp.lt.s32.totalorder %v5971_v61, 0  ;;  %v390_v59 = vshrl.u32 %v5941_v26, 5  ;;  %v6047_v28 = vsub.s32 %v5838_v29, %v380_v37 }
  0xd7   :  { %v1276_v52 = vsel %vm1252_vm9, %v1000_v53, %v4585_v39  ;;  %2325 = vmatprep.mubr.f32.mxu0 %v4598_v3  ;;  %v6050_v57 = vmul.u32.u64.low 2804876602, %v6003_v33  ;;  %v6051_v58 = vmul.u32.u64.high 2804876602, %v6003_v33, %v6050_v57  ;;  %v1118_v2 = vsel %vm1094_vm2, %v1063_v35, %v1065_v47  ;;  %vm6093_vm12 = vmand %vm550_vm11, %vm511_vm13 }
  0xd8   :  { %v870_v27 = vpop.permute.xlu1 %869  ;;  %2362 = vmatprep.subr.mxu1 %v1276_v52  ;;  %v1067_v34 = vpop.permute.xlu0 %1066  ;;  %v1275_v24 = vsel %vm1252_vm9, %v999_v41, %v1223_v40  ;;  %v6056_v9 = vmul.u32.u64.low 2804876602, %v6013_v46  ;;  %v6057_v12 = vmul.u32.u64.high 2804876602, %v6013_v46, %v6056_v9  ;;  %vm702_vm4 = vcmp.eq.s32.totalorder %v5960_v36, 48  ;;  %v6165_v40 = vld [vmem:[%s6979_s0 + $0x70] sm:$0xff] }
  0xd9   :  { %v1119_v29 = vsel %vm1094_vm2, %v1065_v47, %v1067_v34  ;;  %2363 = vmatpush1.msra.mxu1 %v1275_v24  ;;  %v6064_v45 = vsel %vm6037_vm6, %v627_v15, %v5933_v0  ;;  %v1224_v50 = vcombine.low %v4587_v32, %v4587_v32  ;;  %v922_v49 = vsel %vm897_vm5, %v868_v38, %v870_v27 }
  0xda   :  { %v1198_v48 = vsel %vm742_vm7, 0.0, %v1119_v29  ;;  %4002 = vmatmul.mubr.msk.f32.gmra.mxu0 %vm1292_vm8, %v6075_v6  ;;  %4005 = vmatmul.mubr.msk.f32.vlgmr.msra.gmra.mxu1 %vm1292_vm8, %v5981_v17  ;;  %v628_v21 = vadd.s32 49, %v5971_v61  ;;  %v401_v51 = vshrl.u32 %v5995_v43, 5  ;;  %v1197_v18 = vsel %vm741_vm0, 0.0, %v1118_v2 }
  0xdb   :  { %4008 = vmatprep.subr.msk.mxu0 %vm1252_vm9, %v1198_v48  ;;  %vm743_vm14 = vcmp.eq.s32.totalorder %v6021_v10, 0  ;;  %vm703_vm3 = vcmp.eq.s32.totalorder %v5965_v19, 48  ;;  %2402 = vmatprep.mubr.f32.mxu1 %v4598_v3  ;;  %v391_v5 = vmul.u32 49, %v390_v59  ;;  %vm704_vm10 = vcmp.eq.s32.totalorder %v6021_v10, 48 }
  0xdc   :  { %v1069_v0 = vpop.permute.xlu1 %1068  ;;  %4009 = vmatpush1.msk.msra.mxu0 %vm1252_vm9, %v1197_v18  ;;  %v872_v56 = vpop.permute.xlu0 %871  ;;  %vm744_vm15 = vcmp.eq.s32.totalorder %v6064_v45, 0  ;;  %2479 = vmatprep.mubr.f32.mxu0 %v4598_v3  ;;  %vm512_vm1 = vcmp.ne.s32.totalorder %v6047_v28, 0  ;;  %v1225_v42 = vcombine.low %v6105_v13, %v6105_v13  ;;  %v1001_v26 = vsel %vm702_vm4, 0.0, %v922_v49 }
  0xdd   :  { %v923_v54 = vsel %vm897_vm5, %v870_v27, %v872_v56  ;;  %vm551_vm0 = vcmp.lt.s32.totalorder %v6047_v28, 0  ;;  %v6114_v31 = vadd.s32 4480, %v4751_v23  ;;  %v6123_v4 = vsel %vm6093_vm12, %v628_v21, %v5971_v61 }
  0xde   :  { %v1002_v25 = vsel %vm703_vm3, 0.0, %v923_v54  ;;  %4006 = vmatmul.mubr.msk.f32.gmra.mxu1 %vm1292_vm8, %v6029_v1  ;;  %vm705_vm7 = vcmp.eq.s32.totalorder %v6064_v45, 48  ;;  %v402_v35 = vmul.u32 49, %v401_v51  ;;  %v629_v36 = vadd.s32 49, %v6047_v28  ;;  %vm6141_vm6 = vmand %vm551_vm0, %vm512_vm1 }
  0xdf   :  { %v1278_v30 = vsel %vm1252_vm9, %v1002_v25, %v4587_v32  ;;  %2408 = vmatprep.mubr.f32.mxu1 %v4598_v3  ;;  %v6130_v19 = vsub.s32 %v5896_v63, %v391_v5  ;;  %v6133_v16 = vadd.s32 4352, %v4751_v23  ;;  %v1120_v11 = vsel %vm1094_vm2, %v1067_v34, %v1069_v0 }
  0xe0   :  { %v874_v62 = vpop.permute.xlu1 %873  ;;  %2445 = vmatprep.subr.mxu0 %v1278_v30  ;;  %v1071_v61 = vpop.permute.xlu0 %1070  ;;  %v1277_v44 = vsel %vm1252_vm9, %v1001_v26, %v1224_v50  ;;  %v412_v63 = vshrl.u32 %v6051_v58, 5  ;;  %v423_v14 = vshrl.u32 %v6057_v12, 5  ;;  %vm745_vm13 = vcmp.eq.s32.totalorder %v6123_v4, 0 }
  0xe1   :  { %v1121_v43 = vsel %vm1094_vm2, %v1069_v0, %v1071_v61  ;;  %2446 = vmatpush1.msra.mxu0 %v1277_v44  ;;  %v6150_v55 = vmul.u32.u64.low 2804876602, %v6114_v31  ;;  %v6151_v37 = vmul.u32.u64.high 2804876602, %v6114_v31, %v6150_v55  ;;  %v924_v47 = vsel %vm897_vm5, %v872_v56, %v874_v62 }
  0xe2   :  { %v1200_v38 = vsel %vm744_vm15, 0.0, %v1121_v43  ;;  %4007 = vmatmul.mubr.msk.f32.gmra.mxu1 %vm1292_vm8, %v6075_v6  ;;  %4010 = vmatmul.mubr.msk.f32.vlgmr.msra.gmra.mxu0 %vm1292_vm8, %v5981_v17  ;;  %vm706_vm11 = vcmp.eq.s32.totalorder %v6123_v4, 48  ;;  %v403_v39 = vsub.s32 %v5944_v60, %v402_v35  ;;  %v1226_v41 = vcombine.low %v6165_v40, %v6165_v40 }
  0xe3   :  { %v1199_v20 = vsel %vm743_vm14, 0.0, %v1120_v11  ;;  %4013 = vmatprep.subr.msk.mxu1 %vm1252_vm9, %v1200_v38  ;;  %2485 = vmatprep.mubr.f32.mxu0 %v4598_v3  ;;  %v6176_v15 = vsel %vm6141_vm6, %v629_v36, %v6047_v28  ;;  %v6179_v60 = vmul.u32.u64.low 2804876602, %v6133_v16  ;;  %v6180_v53 = vmul.u32.u64.high 2804876602, %v6133_v16, %v6179_v60 }
  0xe4   :  { %v1073_v8 = vpop.permute.xlu1 %1072  ;;  %4014 = vmatpush1.msk.msra.mxu1 %vm1252_vm9, %v1199_v20  ;;  %v876_v59 = vpop.permute.xlu0 %875  ;;  %2562 = vmatprep.mubr.f32.mxu1 %v4598_v3  ;;  %vm513_vm4 = vcmp.ne.s32.totalorder %v6130_v19, 0  ;;  %vm552_vm14 = vcmp.lt.s32.totalorder %v6130_v19, 0  ;;  %v413_v52 = vmul.u32 49, %v412_v63  ;;  %v424_v57 = vmul.u32 49, %v423_v14 }
  0xe5   :  { %v1003_v28 = vsel %vm704_vm10, 0.0, %v924_v47  ;;  %v925_v58 = vsel %vm897_vm5, %v874_v62, %v876_v59  ;;  %v630_v2 = vadd.s32 49, %v6130_v19  ;;  %v6191_v27 = vadd.s32 4736, %v4751_v23  ;;  %vm6205_vm10 = vmand %vm552_vm14, %vm513_vm4 }
  0xe6   :  { %v1004_v34 = vsel %vm705_vm7, 0.0, %v925_v58  ;;  %4011 = vmatmul.mubr.msk.f32.gmra.mxu0 %vm1292_vm8, %v6029_v1  ;;  %vm746_vm3 = vcmp.eq.s32.totalorder %v6176_v15, 0  ;;  %vm514_vm12 = vcmp.ne.s32.totalorder %v403_v39, 0  ;;  %vm553_vm15 = vcmp.lt.s32.totalorder %v403_v39, 0 }
  0xe7   :  { %v1280_v10 = vsel %vm1252_vm9, %v1004_v34, %v6105_v13  ;;  %2491 = vmatprep.mubr.f32.mxu0 %v4598_v3  ;;  %vm707_vm1 = vcmp.eq.s32.totalorder %v6176_v15, 48  ;;  %v631_v9 = vadd.s32 49, %v403_v39  ;;  %v6211_v12 = vadd.s32 4608, %v4751_v23  ;;  %vm6225_vm0 = vmand %vm553_vm15, %vm514_vm12 }
  0xe8   :  { %v1122_v29 = vsel %vm1094_vm2, %v1071_v61, %v1073_v8  ;;  %v878_v45 = vpop.permute.xlu1 %877  ;;  %2528 = vmatprep.subr.mxu1 %v1280_v10  ;;  %v1075_v32 = vpop.permute.xlu0 %1074  ;;  %v1279_v50 = vsel %vm1252_vm9, %v1003_v28, %v1225_v42  ;;  %v6219_v49 = vsub.s32 %v6003_v33, %v413_v52  ;;  %v425_v48 = vsub.s32 %v6013_v46, %v424_v57  ;;  %v4591_v57 = vld [vmem:[%s6979_s0 + $0x78] sm:$0xff] }
  0xe9   :  { %v1123_v21 = vsel %vm1094_vm2, %v1073_v8, %v1075_v32  ;;  %2529 = vmatpush1.msra.mxu1 %v1279_v50  ;;  %v445_v18 = vshrl.u32 %v6151_v37, 5  ;;  %v6231_v22 = vmul.u32.u64.low 2804876602, %v6191_v27  ;;  %v6232_v5 = vmul.u32.u64.high 2804876602, %v6191_v27, %v6231_v22 }
  0xea   :  { %v926_v33 = vsel %vm897_vm5, %v876_v59, %v878_v45  ;;  %v1202_v46 = vsel %vm746_vm3, 0.0, %v1123_v21  ;;  %4012 = vmatmul.mubr.msk.f32.gmra.mxu0 %vm1292_vm8, %v6075_v6  ;;  %4015 = vmatmul.mubr.msk.f32.vlgmr.msra.gmra.mxu1 %vm1292_vm8, %v5981_v17  ;;  %v6244_v0 = vsel %vm6205_vm10, %v630_v2, %v6130_v19  ;;  %v6247_v56 = vadd.s32 4864, %v4751_v23 }
  0xeb   :  { %v1201_v13 = vsel %vm745_vm13, 0.0, %v1122_v29  ;;  %4018 = vmatprep.subr.msk.mxu0 %vm1252_vm9, %v1202_v46  ;;  %2568 = vmatprep.mubr.f32.mxu1 %v4598_v3  ;;  %v434_v42 = vshrl.u32 %v6180_v53, 5  ;;  %v6255_v26 = vmul.u32.u64.low 2804876602, %v6211_v12  ;;  %v6256_v54 = vmul.u32.u64.high 2804876602, %v6211_v12, %v6255_v26 }
  0xec   :  { %v1077_v25 = vpop.permute.xlu1 %1076  ;;  %4019 = vmatpush1.msk.msra.mxu0 %vm1252_vm9, %v1201_v13  ;;  %v880_v35 = vpop.permute.xlu0 %879  ;;  %v670_v23 = vsel %vm6225_vm0, %v631_v9, %v403_v39  ;;  %2645 = vmatprep.mubr.f32.mxu0 %v4598_v3  ;;  %vm515_vm7 = vcmp.ne.s32.totalorder %v6219_v49, 0  ;;  %vm516_vm6 = vcmp.ne.s32.totalorder %v425_v48, 0  ;;  %vm555_vm13 = vcmp.lt.s32.totalorder %v425_v48, 0 }
  0xed   :  { %v1005_v30 = vsel %vm706_vm11, 0.0, %v926_v33  ;;  %v927_v36 = vsel %vm897_vm5, %v878_v45, %v880_v35  ;;  %vm554_vm4 = vcmp.lt.s32.totalorder %v6219_v49, 0  ;;  %v446_v19 = vmul.u32 49, %v445_v18  ;;  %vm6278_vm14 = vmand %vm555_vm13, %vm516_vm6 }
  0xee   :  { %v1006_v11 = vsel %vm707_vm1, 0.0, %v927_v36  ;;  %4016 = vmatmul.mubr.msk.f32.gmra.mxu1 %vm1292_vm8, %v6029_v1  ;;  %v633_v62 = vadd.s32 49, %v425_v48  ;;  %v6272_v61 = vmul.u32.u64.low 2804876602, %v6247_v56  ;;  %v6273_v44 = vmul.u32.u64.high 2804876602, %v6247_v56, %v6272_v61  ;;  %vm593_vm15 = vmand %vm554_vm4, %vm515_vm7 }
  0xef   :  { %v1282_v4 = vsel %vm1252_vm9, %v1006_v11, %v6165_v40  ;;  %vm748_vm11 = vcmp.eq.s32.totalorder %v670_v23, 0  ;;  %2574 = vmatprep.mubr.f32.mxu1 %v4598_v3  ;;  %v435_v63 = vmul.u32 49, %v434_v42  ;;  %vm747_vm3 = vcmp.eq.s32.totalorder %v6244_v0, 0 }
  0xf0   :  { %v1124_v14 = vsel %vm1094_vm2, %v1075_v32, %v1077_v25  ;;  %v882_v43 = vpop.permute.xlu1 %881  ;;  %2611 = vmatprep.subr.mxu0 %v1282_v4  ;;  %v1079_v55 = vpop.permute.xlu0 %1078  ;;  %v1281_v37 = vsel %vm1252_vm9, %v1005_v30, %v1226_v41  ;;  %v632_v47 = vadd.s32 49, %v6219_v49  ;;  %vm708_vm12 = vcmp.eq.s32.totalorder %v6244_v0, 48 }
  0xf1   :  { %v1125_v38 = vsel %vm1094_vm2, %v1077_v25, %v1079_v55  ;;  %2612 = vmatpush1.msra.mxu0 %v1281_v37  ;;  %v6296_v39 = vsub.s32 %v6114_v31, %v446_v19  ;;  %v928_v20 = vsel %vm897_vm5, %v880_v35, %v882_v43  ;;  %v6306_v41 = vsel %vm6278_vm14, %v633_v62, %v425_v48 }
  0xf2   :  { %v1204_v40 = vsel %vm748_vm11, 0.0, %v1125_v38  ;;  %4017 = vmatmul.mubr.msk.f32.gmra.mxu1 %vm1292_vm8, %v6075_v6  ;;  %4020 = vmatmul.mubr.msk.f32.vlgmr.msra.gmra.mxu0 %vm1292_vm8, %v5981_v17  ;;  %v467_v15 = vshrl.u32 %v6232_v5, 5  ;;  %v1203_v31 = vsel %vm747_vm3, 0.0, %v1124_v14  ;;  %vm709_vm10 = vcmp.eq.s32.totalorder %v670_v23, 48 }
  0xf3   :  { %4023 = vmatprep.subr.msk.mxu1 %vm1252_vm9, %v1204_v40  ;;  %2651 = vmatprep.mubr.f32.mxu0 %v4598_v3  ;;  %v436_v60 = vsub.s32 %v6133_v16, %v435_v63  ;;  %v456_v53 = vshrl.u32 %v6256_v54, 5  ;;  %v671_v8 = vsel %vm593_vm15, %v632_v47, %v6219_v49  ;;  %v1227_v28 = vcombine.low %v4591_v57, %v4591_v57 }
  0xf4   :  { %v1081_v59 = vpop.permute.xlu1 %1080  ;;  %4024 = vmatpush1.msk.msra.mxu1 %vm1252_vm9, %v1203_v31  ;;  %v884_v52 = vpop.permute.xlu0 %883  ;;  %2728 = vmatprep.mubr.f32.mxu1 %v4598_v3  ;;  %v1007_v58 = vsel %vm708_vm12, 0.0, %v928_v20  ;;  %vm750_vm1 = vcmp.eq.s32.totalorder %v6306_v41, 0  ;;  %vm518_vm0 = vcmp.ne.s32.totalorder %v6296_v39, 0  ;;  %vm557_vm7 = vcmp.lt.s32.totalorder %v6296_v39, 0 }
  0xf5   :  { %v929_v16 = vsel %vm897_vm5, %v882_v43, %v884_v52  ;;  %v468_v34 = vmul.u32 49, %v467_v15  ;;  %v478_v10 = vshrl.u32 %v6273_v44, 5  ;;  %vm517_vm6 = vcmp.ne.s32.totalorder %v436_v60, 0  ;;  %vm6340_vm14 = vmand %vm557_vm7, %vm518_vm0 }
  0xf6   :  { %v1008_v2 = vsel %vm709_vm10, 0.0, %v929_v16  ;;  %4021 = vmatmul.mubr.msk.f32.gmra.mxu0 %vm1292_vm8, %v6029_v1  ;;  %vm556_vm13 = vcmp.lt.s32.totalorder %v436_v60, 0  ;;  %v457_v9 = vmul.u32 49, %v456_v53  ;;  %vm749_vm4 = vcmp.eq.s32.totalorder %v671_v8, 0 }
  0xf7   :  { %v1284_v24 = vsel %vm1252_vm9, %v1008_v2, %v4591_v57  ;;  %2657 = vmatprep.mubr.f32.mxu0 %v4598_v3  ;;  %v1126_v29 = vsel %vm1094_vm2, %v1079_v55, %v1081_v59  ;;  %v1283_v50 = vsel %vm1252_vm9, %v1007_v58, %v1227_v28  ;;  %v635_v49 = vadd.s32 49, %v6296_v39  ;;  %vm6353_vm3 = vmand %vm556_vm13, %vm517_vm6  ;;  %v4594_v58 = vld [vmem:[%s6979_s0 + $0x98] sm:$0xf] }
  0xf8   :  { %v886_v45 = vpop.permute.xlu1 %885  ;;  %2694 = vmatprep.subr.mxu1 %v1284_v24  ;;  %v1083_v32 = vpop.permute.xlu0 %1082  ;;  %vm710_vm11 = vcmp.eq.s32.totalorder %v671_v8, 48  ;;  %v634_v21 = vadd.s32 49, %v436_v60  ;;  %v469_v33 = vsub.s32 %v6191_v27, %v468_v34  ;;  %v479_v46 = vmul.u32 49, %v478_v10  ;;  %v4592_v27 = vld [vmem:[%s6979_s0 + $0x80] sm:$0xff] }
  0xf9   :  { %v1127_v48 = vsel %vm1094_vm2, %v1081_v59, %v1083_v32  ;;  %2695 = vmatpush1.msra.mxu1 %v1283_v50  ;;  %v930_v18 = vsel %vm897_vm5, %v884_v52, %v886_v45  ;;  %v1205_v0 = vsel %vm749_vm4, 0.0, %v1126_v29  ;;  %vm711_vm12 = vcmp.eq.s32.totalorder %v6306_v41, 48 }
  0xfa   :  { %v1206_v22 = vsel %vm750_vm1, 0.0, %v1127_v48  ;;  %4022 = vmatmul.mubr.msk.f32.gmra.mxu0 %vm1292_vm8, %v6075_v6  ;;  %4025 = vmatmul.mubr.msk.f32.vlgmr.msra.gmra.mxu1 %vm1292_vm8, %v5981_v17  ;;  %v458_v13 = vsub.s32 %v6211_v12, %v457_v9  ;;  %v674_v54 = vsel %vm6340_vm14, %v635_v49, %v6296_v39  ;;  %v1228_v25 = vcombine.low %v4592_v27, %v4592_v27  ;;  %v4593_v39 = vld [vmem:[%s6979_s0 + $0x88] sm:$0xff] }
  0xfb   :  { %4028 = vmatprep.subr.msk.mxu0 %vm1252_vm9, %v1206_v22  ;;  %2734 = vmatprep.mubr.f32.mxu1 %v4598_v3  ;;  %v1009_v35 = vsel %vm710_vm11, 0.0, %v930_v18  ;;  %v673_v12 = vsel %vm6353_vm3, %v634_v21, %v436_v60  ;;  %vm520_vm15 = vcmp.ne.s32.totalorder %v469_v33, 0  ;;  %vm559_vm10 = vcmp.lt.s32.totalorder %v469_v33, 0 }
  0xfc   :  { %v1085_v42 = vpop.permute.xlu1 %1084  ;;  %4029 = vmatpush1.msk.msra.mxu0 %vm1252_vm9, %v1205_v0  ;;  %v888_v26 = vpop.permute.xlu0 %887  ;;  %2811 = vmatprep.mubr.f32.mxu0 %v4598_v3  ;;  %v480_v36 = vsub.s32 %v6247_v56, %v479_v46  ;;  %vm752_vm1 = vcmp.eq.s32.totalorder %v674_v54, 0  ;;  %vm519_vm0 = vcmp.ne.s32.totalorder %v458_v13, 0  ;;  %vm558_vm7 = vcmp.lt.s32.totalorder %v458_v13, 0  ;;  %vm598_vm4 = vmand %vm559_vm10, %vm520_vm15 }
  0xfd   :  { %v931_v23 = vsel %vm897_vm5, %v886_v45, %v888_v26  ;;  %vm751_vm6 = vcmp.eq.s32.totalorder %v673_v12, 0  ;;  %v1128_v11 = vsel %vm1094_vm2, %v1083_v32, %v1085_v42  ;;  %v1285_v44 = vsel %vm1252_vm9, %v1009_v35, %v1228_v25  ;;  %vm6393_vm11 = vmand %vm558_vm7, %vm519_vm0  ;;  %v4595_v45 = vld [vmem:[%s6979_s0 + $0x90] sm:$0xff]  ;;  %s4601_s0 = smov 49  }
  0xfe   :  { %v1010_v30 = vsel %vm711_vm12, 0.0, %v931_v23  ;;  %4026 = vmatmul.mubr.msk.f32.gmra.mxu1 %vm1292_vm8, %v6029_v1  ;;  %v637_v4 = vadd.s32 49, %v469_v33  ;;  %vm712_vm13 = vcmp.eq.s32.totalorder %v673_v12, 48  ;;  %v636_v56 = vadd.s32 49, %v458_v13 }
  0xff   :  { %v1286_v19 = vsel %vm1252_vm9, %v1010_v30, %v4592_v27  ;;  %2740 = vmatprep.mubr.f32.mxu1 %v4598_v3  ;;  %vm521_vm14 = vcmp.ne.s32.totalorder %v480_v36, 0  ;;  %vm560_vm3 = vcmp.lt.s32.totalorder %v480_v36, 0  ;;  %v1207_v55 = vsel %vm751_vm6, 0.0, %v1128_v11 }
 0x100   :  { %v890_v62 = vpop.permute.xlu1 %889  ;;  %2777 = vmatprep.subr.mxu0 %v1286_v19  ;;  %v1087_v61 = vpop.permute.xlu0 %1086  ;;  %vm713_vm12 = vcmp.eq.s32.totalorder %v674_v54, 48  ;;  %v676_v38 = vsel %vm598_vm4, %v637_v4, %v469_v33  ;;  %v1229_v20 = vcombine.low %v4593_v39, %v4593_v39  ;;  %v638_v40 = vadd.s32 49, %v480_v36  ;;  %vm599_vm15 = vmand %vm560_vm3, %vm521_vm14 }
 0x101   :  { %v1129_v7 = vsel %vm1094_vm2, %v1085_v42, %v1087_v61  ;;  %2778 = vmatpush1.msra.mxu0 %v1285_v44  ;;  %v932_v63 = vsel %vm897_vm5, %v888_v26, %v890_v62  ;;  %v675_v15 = vsel %vm6393_vm11, %v636_v56, %v458_v13  ;;  %vm754_vm10 = vcmp.eq.s32.totalorder %v676_v38, 0 }
 0x102   :  { %v1208_v14 = vsel %vm752_vm1, 0.0, %v1129_v7  ;;  %4027 = vmatmul.mubr.msk.f32.gmra.mxu1 %vm1292_vm8, %v6075_v6  ;;  %4030 = vmatmul.mubr.msk.f32.vlgmr.msra.gmra.mxu0 %vm1292_vm8, %v5981_v17  ;;  %v1011_v41 = vsel %vm712_vm13, 0.0, %v932_v63  ;;  %vm753_vm1 = vcmp.eq.s32.totalorder %v675_v15, 0  ;;  %v677_v28 = vsel %vm599_vm15, %v638_v40, %v480_v36 }
 0x103   :  { %4033 = vmatprep.subr.msk.mxu1 %vm1252_vm9, %v1208_v14  ;;  %2817 = vmatprep.mubr.f32.mxu0 %v4598_v3  ;;  %v1287_v57 = vsel %vm1252_vm9, %v1011_v41, %v1229_v20  ;;  %v1231_v16 = vcombine.low %v4594_v58, %v4594_v58  ;;  %vm714_vm0 = vcmp.eq.s32.totalorder %v675_v15, 48  ;;  %vm975_vm7 = vcmask 285696  }
 0x104   :  { %v1089_v37 = vpop.permute.xlu1 %1088  ;;  %4034 = vmatpush1.msk.msra.mxu1 %vm1252_vm9, %v1207_v55  ;;  %v892_v47 = vpop.permute.xlu0 %891  ;;  %2894 = vmatprep.mubr.f32.mxu1 %v4598_v3  ;;  %vm755_vm6 = vcmp.eq.s32.totalorder %v677_v28, 0  ;;  %vm715_vm13 = vcmp.eq.s32.totalorder %v676_v38, 48  ;;  %vm716_vm4 = vcmp.eq.s32.totalorder %v677_v28, 48  ;;  %v1230_v32 = vcombine.low %v4595_v45, %v4595_v45 }
 0x105   :  { %v933_v31 = vsel %vm897_vm5, %v890_v62, %v892_v47  ;;  %v1130_v8 = vsel %vm1094_vm2, %v1087_v61, %v1089_v37 }
 0x106   :  { %v1012_v60 = vsel %vm713_vm12, 0.0, %v933_v31  ;;  %4031 = vmatmul.mubr.msk.f32.gmra.mxu0 %vm1292_vm8, %v6029_v1  ;;  %v1209_v24 = vsel %vm753_vm1, 0.0, %v1130_v8 }
 0x107   :  { %v1288_v53 = vsel %vm1252_vm9, %v1012_v60, %v4593_v39  ;;  %2823 = vmatprep.mubr.f32.mxu0 %v4598_v3 }
 0x108   :  { %v894_v59 = vpop.permute.xlu1 %893  ;;  %2860 = vmatprep.subr.mxu1 %v1288_v53  ;;  %v1091_v52 = vpop.permute.xlu0 %1090 }
 0x109   :  { %v1131_v2 = vsel %vm1094_vm2, %v1089_v37, %v1091_v52  ;;  %2861 = vmatpush1.msra.mxu1 %v1287_v57  ;;  %v934_v34 = vsel %vm897_vm5, %v892_v47, %v894_v59 }
 0x10a   :  { %v1210_v10 = vsel %vm754_vm10, 0.0, %v1131_v2  ;;  %4032 = vmatmul.mubr.msk.f32.gmra.mxu0 %vm1292_vm8, %v6075_v6  ;;  %4035 = vmatmul.mubr.msk.f32.vlgmr.msra.gmra.mxu1 %vm1292_vm8, %v5981_v17  ;;  %v1013_v50 = vsel %vm714_vm0, 0.0, %v934_v34 }
 0x10b   :  { %4038 = vmatprep.subr.msk.mxu0 %vm1252_vm9, %v1210_v10  ;;  %2900 = vmatprep.mubr.f32.mxu1 %v4598_v3  ;;  %v1289_v46 = vsel %vm1252_vm9, %v1013_v50, %v1230_v32 }
 0x10c   :  { %v1093_v9 = vpop.permute.xlu1 %1092  ;;  %4039 = vmatpush1.msk.msra.mxu0 %vm1252_vm9, %v1209_v24  ;;  %v896_v29 = vpop.permute.xlu0 %895  ;;  %4130 = vmatprep.subr.mxu1 %v4598_v3 }
 0x10d   :  { %v1132_v49 = vsel %vm1094_vm2, %v1091_v52, %v1093_v9  ;;  %v935_v48 = vsel %vm897_vm5, %v894_v59, %v896_v29  ;;  %v976_v21 = vsel %vm975_vm7, %v896_v29, 0.0  ;;  %2977 = vmatprep.mubr.f32.mxu0 %v4598_v3  ;;  %vm4600_vm2 = vmmov 0  }
 0x10e   :  { %v1211_v51 = vsel %vm755_vm6, 0.0, %v1132_v49  ;;  %v1014_v18 = vsel %vm715_vm13, 0.0, %v935_v48  ;;  %v1015_v22 = vsel %vm716_vm4, 0.0, %v976_v21  ;;  %4036 = vmatmul.mubr.msk.f32.gmra.mxu1 %vm1292_vm8, %v6029_v1  ;;  %vm3195_vm5 = vcmask 400384  }
 0x10f   :  { %4131 = vmatpush3.msk.msra.mxu1 %vm1252_vm9, %v1211_v51  ;;  %v1290_v5 = vsel %vm1252_vm9, %v1014_v18, %v4595_v45  ;;  %2906 = vmatprep.mubr.f32.mxu1 %v4598_v3  ;;  %v1291_v33 = vsel %vm1252_vm9, %v1015_v22, %v1231_v16  ;;  %vm3076_vm9 = vcmask 293888  }
 0x110   :  { %2943 = vmatprep.subr.mxu0 %v1290_v5  ;;  %4132 = vmatprep.subr.mxu1 %v4598_v3 }
 0x111   :  { %2944 = vmatpush1.msra.mxu0 %v1289_v46  ;;  %4133 = vmatpush3.msra.mxu1 %v1291_v33 }
 0x112   :  { %4037 = vmatmul.mubr.msk.f32.gmra.mxu1 %vm1292_vm8, %v6075_v6  ;;  %4040 = vmatmul.mubr.msk.f32.vlgmr.msra.gmra.mxu0 %vm1292_vm8, %v5981_v17 }
 0x113   :  { %2983 = vmatprep.mubr.f32.mxu0 %v4598_v3  ;;  %4134 = vmatprep.mubr.msk.f32.mxu1 %vm4600_vm2, %v4598_v3 }
 0x116   :  { %4041 = vmatmul.mubr.msk.f32.gmra.mxu0 %vm1292_vm8, %v6029_v1  ;;  %4135 = vmatmul.mubr.msk.f32.vlgmr.msra.gmra.mxu1 %vm1292_vm8, %v5981_v17 }
 0x117   :  { %2989 = vmatprep.mubr.f32.mxu0 %v4598_v3  ;;  %4137 = vmatprep.mubr.msk.f32.mxu1 %vm4600_vm2, %v4598_v3 }
 0x119   :  { %v6470_v17 = vpop.permute.xlu0 %3316 }
 0x11a   :  { %4042 = vmatmul.mubr.msk.f32.gmra.mxu0 %vm1292_vm8, %v6075_v6  ;;  %4138 = vmatmul.mubr.msk.f32.gmra.mxu1 %vm1292_vm8, %v6029_v1 }
 0x11b   :  { %4140 = vmatprep.mubr.msk.f32.mxu1 %vm4600_vm2, %v4598_v3 }
 0x11e   :  { %4141 = vmatmul.mubr.msk.f32.gmra.mxu1 %vm1292_vm8, %v6075_v6  ;;  %vm3630_vm8 = vcmask 695296  }
 0x141   :  { %v6466_v0 = vpop.f32.mrf.mxu0 }
 0x143   :  { %v6468_v13 = vpop.f32.mrf.mxu0 }
 0x145   :  { %v1491_v42 = vpop.f32.mrf.mxu0 }
 0x146   :  { %v3632_v26 = vadd.f32 %v6470_v17, %v1491_v42 }
 0x147   :  { %v1493_v54 = vpop.f32.mrf.mxu0 }
 0x148   :  { %v3633_v27 = vadd.f32 %v6470_v17, %v1493_v54  ;;  %v4086_v25 = vmul.f32 -1.442695, %v3632_v26 }
 0x149   :  { %v1497_v35 = vpop.f32.mrf.mxu0 }
 0x14a   :  { %3117 = vrot.lane.b32.xlu1 %v1497_v35, %s4601_s0  ;;  %4267 = vpow2.f32 %v4086_v25  ;;  %v4087_v3 = vmul.f32 -1.442695, %v3633_v27 }
 0x14b   :  { %v6475_v1 = vpop.f32.mrf.mxu1  ;;  %v1499_v6 = vpop.f32.mrf.mxu0 }
 0x14c   :  { %4269 = vpow2.f32 %v4087_v3 }
 0x14d   :  { %v6477_v12 = vpop.f32.mrf.mxu1 }
 0x14e   :  { %3119 = vrot.lane.b32.xlu1 %v1499_v6, %s4601_s0 }
 0x14f   :  { %v1574_v23 = vpop.f32.mrf.mxu1 }
 0x150   :  { %v3634_v30 = vadd.f32 %v6470_v17, %v1574_v23 }
 0x151   :  { %v1576_v36 = vpop.f32.mrf.mxu1 }
 0x152   :  { %v3635_v19 = vadd.f32 %v6470_v17, %v1576_v36  ;;  %v4088_v11 = vmul.f32 -1.442695, %v3634_v30 }
 0x153   :  { %v1580_v62 = vpop.f32.mrf.mxu1  ;;  %v6482_v61 = vpop.f32.mrf.mxu0 }
 0x154   :  { %3121 = vrot.lane.b32.xlu0 %v1580_v62, %s4601_s0  ;;  %4271 = vpow2.f32 %v4088_v11  ;;  %v4089_v44 = vmul.f32 -1.442695, %v3635_v19 }
 0x155   :  { %v1582_v4 = vpop.f32.mrf.mxu1  ;;  %v6485_v7 = vpop.f32.mrf.mxu0 }
 0x156   :  { %3123 = vrot.lane.b32.xlu1 %v1582_v4, %s4601_s0  ;;  %4273 = vpow2.f32 %v4089_v44 }
 0x157   :  { %v4268_v56 = vpop.eup %4267  ;;  %v1657_v63 = vpop.f32.mrf.mxu0 }
 0x158   :  { %v3636_v14 = vadd.f32 %v6470_v17, %v1657_v63  ;;  %v3788_v43 = vadd.f32 1.0, %v4268_v56 }
 0x159   :  { %v4270_v55 = vpop.eup %4269  ;;  %v1659_v37 = vpop.f32.mrf.mxu0 }
 0x15a   :  { %v3637_v47 = vadd.f32 %v6470_v17, %v1659_v37  ;;  %v4090_v38 = vmul.f32 -1.442695, %v3636_v14  ;;  %v3789_v39 = vadd.f32 1.0, %v4270_v55  ;;  %4275 = vrcp.f32 %v3788_v43 }
 0x15b   :  { %v1663_v20 = vpop.f32.mrf.mxu0  ;;  %v6490_v40 = vpop.f32.mrf.mxu1 }
 0x15c   :  { %3125 = vrot.lane.b32.xlu0 %v1663_v20, %s4601_s0  ;;  %4277 = vpow2.f32 %v4090_v38  ;;  %v4091_v41 = vmul.f32 -1.442695, %v3637_v47 }
 0x15d   :  { %v1665_v15 = vpop.f32.mrf.mxu0  ;;  %v6493_v31 = vpop.f32.mrf.mxu1  ;;  %4279 = vrcp.f32 %v3789_v39 }
 0x15e   :  { %3127 = vrot.lane.b32.xlu1 %v1665_v15, %s4601_s0  ;;  %4281 = vpow2.f32 %v4091_v41 }
 0x15f   :  { %v1740_v60 = vpop.f32.mrf.mxu1 }
 0x160   :  { %v3638_v53 = vadd.f32 %v6470_v17, %v1740_v60 }
 0x161   :  { %v4272_v8 = vpop.eup %4271  ;;  %v1742_v59 = vpop.f32.mrf.mxu1 }
 0x162   :  { %v6497_v52 = vpop.f32.mrf.mxu0  ;;  %v3639_v57 = vadd.f32 %v6470_v17, %v1742_v59  ;;  %v4092_v28 = vmul.f32 -1.442695, %v3638_v53  ;;  %v3790_v58 = vadd.f32 1.0, %v4272_v8 }
 0x163   :  { %v4274_v16 = vpop.eup %4273  ;;  %v1746_v2 = vpop.f32.mrf.mxu1 }
 0x164   :  { %3129 = vrot.lane.b32.xlu0 %v1746_v2, %s4601_s0  ;;  %v6501_v34 = vpop.f32.mrf.mxu0  ;;  %4283 = vpow2.f32 %v4092_v28  ;;  %v4093_v10 = vmul.f32 -1.442695, %v3639_v57  ;;  %v3791_v24 = vadd.f32 1.0, %v4274_v16 }
 0x165   :  { %v1748_v9 = vpop.f32.mrf.mxu1  ;;  %4285 = vrcp.f32 %v3790_v58 }
 0x166   :  { %3131 = vrot.lane.b32.xlu1 %v1748_v9, %s4601_s0  ;;  %v1823_v29 = vpop.f32.mrf.mxu0  ;;  %4287 = vpow2.f32 %v4093_v10 }
 0x167   :  { %v4276_v45 = vpop.eup %4275  ;;  %v3640_v32 = vadd.f32 %v6470_v17, %v1823_v29  ;;  %4289 = vrcp.f32 %v3791_v24 }
 0x168   :  { %v1825_v50 = vpop.f32.mrf.mxu0  ;;  %3905 = vst [vmem:[%s6982_s3 + $0x138] sm:$0xff] %v4276_v45 }
 0x169   :  { %v4278_v49 = vpop.eup %4277  ;;  %v3641_v48 = vadd.f32 %v6470_v17, %v1825_v50  ;;  %v4094_v21 = vmul.f32 -1.442695, %v3640_v32 }
 0x16a   :  { %v4280_v51 = vpop.eup %4279  ;;  %v1829_v18 = vpop.f32.mrf.mxu0  ;;  %v3792_v5 = vadd.f32 1.0, %v4278_v49 }
 0x16b   :  { %v6509_v22 = vpop.f32.mrf.mxu1  ;;  %v4282_v33 = vpop.eup %4281  ;;  %3133 = vrot.lane.b32.xlu0 %v1829_v18, %s4601_s0  ;;  %4291 = vpow2.f32 %v4094_v21  ;;  %v4095_v46 = vmul.f32 -1.442695, %v3641_v48  ;;  %3906 = vst [vmem:[%s6982_s3 + $0x140] sm:$0xff] %v4280_v51 }
 0x16c   :  { %v1831_v42 = vpop.f32.mrf.mxu0  ;;  %v3793_v54 = vadd.f32 1.0, %v4282_v33  ;;  %4293 = vrcp.f32 %v3792_v5 }
 0x16d   :  { %v6515_v26 = vpop.f32.mrf.mxu1  ;;  %3135 = vrot.lane.b32.xlu1 %v1831_v42, %s4601_s0  ;;  %4295 = vpow2.f32 %v4095_v46 }
 0x16e   :  { %4297 = vrcp.f32 %v3793_v54 }
 0x16f   :  { %v1906_v27 = vpop.f32.mrf.mxu1 }
 0x170   :  { %v3642_v25 = vadd.f32 %v6470_v17, %v1906_v27 }
 0x171   :  { %v1908_v35 = vpop.f32.mrf.mxu1  ;;  %v4284_v3 = vpop.eup %4283 }
 0x172   :  { %v3643_v6 = vadd.f32 %v6470_v17, %v1908_v35  ;;  %v4096_v23 = vmul.f32 -1.442695, %v3642_v25  ;;  %v4286_v30 = vpop.eup %4285  ;;  %v3794_v36 = vadd.f32 1.0, %v4284_v3  ;;  %v6520_v11 = vpop.f32.mrf.mxu0 }
 0x173   :  { %v1912_v19 = vpop.f32.mrf.mxu1  ;;  %v4288_v62 = vpop.eup %4287  ;;  %3907 = vst [vmem:[%s6982_s3 + $0x148] sm:$0xff] %v4286_v30 }
 0x174   :  { %4299 = vpow2.f32 %v4096_v23  ;;  %v4097_v44 = vmul.f32 -1.442695, %v3643_v6  ;;  %3137 = vrot.lane.b32.xlu0 %v1912_v19, %s4601_s0  ;;  %v4290_v4 = vpop.eup %4289  ;;  %v3795_v56 = vadd.f32 1.0, %v4288_v62  ;;  %v6526_v14 = vpop.f32.mrf.mxu0 }
 0x175   :  { %4301 = vrcp.f32 %v3794_v36  ;;  %v1914_v63 = vpop.f32.mrf.mxu1  ;;  %3908 = vst [vmem:[%s6982_s3 + $0x150] sm:$0xff] %v4290_v4 }
 0x176   :  { %4303 = vpow2.f32 %v4097_v44  ;;  %3139 = vrot.lane.b32.xlu1 %v1914_v63, %s4601_s0  ;;  %v1989_v43 = vpop.f32.mrf.mxu0 }
 0x177   :  { %4305 = vrcp.f32 %v3795_v56  ;;  %v3644_v55 = vadd.f32 %v6470_v17, %v1989_v43 }
 0x178   :  { %v4292_v37 = vpop.eup %4291  ;;  %v1991_v47 = vpop.f32.mrf.mxu0 }
 0x179   :  { %v4294_v38 = vpop.eup %4293  ;;  %v3796_v39 = vadd.f32 1.0, %v4292_v37  ;;  %v4098_v20 = vmul.f32 -1.442695, %v3644_v55  ;;  %v3645_v41 = vadd.f32 %v6470_v17, %v1991_v47 }
 0x17a   :  { %v4296_v15 = vpop.eup %4295  ;;  %3909 = vst [vmem:[%s6982_s3 + $0x158] sm:$0xff] %v4294_v38  ;;  %v1995_v60 = vpop.f32.mrf.mxu0 }
 0x17b   :  { %v6537_v53 = vpop.f32.mrf.mxu1  ;;  %v4298_v8 = vpop.eup %4297  ;;  %v3797_v59 = vadd.f32 1.0, %v4296_v15  ;;  %4307 = vrcp.f32 %v3796_v39  ;;  %v4099_v57 = vmul.f32 -1.442695, %v3645_v41  ;;  %3141 = vrot.lane.b32.xlu0 %v1995_v60, %s4601_s0 }
 0x17c   :  { %3910 = vst [vmem:[%s6982_s3 + $0x160] sm:$0xff] %v4298_v8  ;;  %4309 = vpow2.f32 %v4098_v20  ;;  %v1997_v28 = vpop.f32.mrf.mxu0 }
 0x17d   :  { %v6543_v58 = vpop.f32.mrf.mxu1  ;;  %4311 = vrcp.f32 %v3797_v59  ;;  %3143 = vrot.lane.b32.xlu1 %v1997_v28, %s4601_s0 }
 0x17e   :  { %4313 = vpow2.f32 %v4099_v57 }
 0x17f   :  { %v2072_v16 = vpop.f32.mrf.mxu1 }
 0x180   :  { %v3646_v2 = vadd.f32 %v6470_v17, %v2072_v16 }
 0x181   :  { %v4300_v10 = vpop.eup %4299  ;;  %v2074_v24 = vpop.f32.mrf.mxu1 }
 0x182   :  { %v4302_v9 = vpop.eup %4301  ;;  %v3798_v29 = vadd.f32 1.0, %v4300_v10  ;;  %v4100_v45 = vmul.f32 -1.442695, %v3646_v2  ;;  %v3647_v32 = vadd.f32 %v6470_v17, %v2074_v24  ;;  %v6551_v48 = vpop.f32.mrf.mxu0 }
 0x183   :  { %v4304_v50 = vpop.eup %4303  ;;  %3911 = vst [vmem:[%s6982_s3 + $0x168] sm:$0xff] %v4302_v9  ;;  %v2078_v49 = vpop.f32.mrf.mxu1 }
 0x184   :  { %v4306_v21 = vpop.eup %4305  ;;  %v3799_v51 = vadd.f32 1.0, %v4304_v50  ;;  %4315 = vrcp.f32 %v3798_v29  ;;  %v4101_v18 = vmul.f32 -1.442695, %v3647_v32  ;;  %3145 = vrot.lane.b32.xlu0 %v2078_v49, %s4601_s0  ;;  %v6557_v33 = vpop.f32.mrf.mxu0 }
 0x185   :  { %3912 = vst [vmem:[%s6982_s3 + $0x170] sm:$0xff] %v4306_v21  ;;  %4317 = vpow2.f32 %v4100_v45  ;;  %v2080_v5 = vpop.f32.mrf.mxu1 }
 0x186   :  { %4319 = vrcp.f32 %v3799_v51  ;;  %3147 = vrot.lane.b32.xlu1 %v2080_v5, %s4601_s0  ;;  %v2155_v46 = vpop.f32.mrf.mxu0 }
 0x187   :  { %4321 = vpow2.f32 %v4101_v18  ;;  %v3648_v42 = vadd.f32 %v6470_v17, %v2155_v46 }
 0x188   :  { %v4308_v54 = vpop.eup %4307  ;;  %v2157_v27 = vpop.f32.mrf.mxu0 }
 0x189   :  { %v4310_v25 = vpop.eup %4309  ;;  %3913 = vst [vmem:[%s6982_s3 + $0x178] sm:$0xff] %v4308_v54  ;;  %v4102_v35 = vmul.f32 -1.442695, %v3648_v42  ;;  %v3649_v3 = vadd.f32 %v6470_v17, %v2157_v27 }
 0x18a   :  { %v4312_v6 = vpop.eup %4311  ;;  %v3800_v23 = vadd.f32 1.0, %v4310_v25  ;;  %v2161_v30 = vpop.f32.mrf.mxu0 }
 0x18b   :  { %v6565_v36 = vpop.f32.mrf.mxu1  ;;  %v4314_v19 = vpop.eup %4313  ;;  %3914 = vst [vmem:[%s6982_s3 + $0x180] sm:$0xff] %v4312_v6  ;;  %4323 = vpow2.f32 %v4102_v35  ;;  %v4103_v62 = vmul.f32 -1.442695, %v3649_v3  ;;  %3149 = vrot.lane.b32.xlu0 %v2161_v30, %s4601_s0 }
 0x18c   :  { %4325 = vrcp.f32 %v3800_v23  ;;  %v3801_v44 = vadd.f32 1.0, %v4314_v19  ;;  %v2163_v4 = vpop.f32.mrf.mxu0 }
 0x18d   :  { %v6571_v56 = vpop.f32.mrf.mxu1  ;;  %4327 = vpow2.f32 %v4103_v62  ;;  %3151 = vrot.lane.b32.xlu1 %v2163_v4, %s4601_s0 }
 0x18e   :  { %4329 = vrcp.f32 %v3801_v44 }
 0x18f   :  { %v2238_v63 = vpop.f32.mrf.mxu1 }
 0x190   :  { %v3650_v43 = vadd.f32 %v6470_v17, %v2238_v63 }
 0x191   :  { %v4316_v55 = vpop.eup %4315  ;;  %v2240_v37 = vpop.f32.mrf.mxu1 }
 0x192   :  { %v4318_v47 = vpop.eup %4317  ;;  %3915 = vst [vmem:[%s6982_s3 + $0x188] sm:$0xff] %v4316_v55  ;;  %v4104_v38 = vmul.f32 -1.442695, %v3650_v43  ;;  %v3651_v39 = vadd.f32 %v6470_v17, %v2240_v37  ;;  %v6579_v60 = vpop.f32.mrf.mxu0 }
 0x193   :  { %v4320_v20 = vpop.eup %4319  ;;  %v3802_v41 = vadd.f32 1.0, %v4318_v47  ;;  %v2244_v15 = vpop.f32.mrf.mxu1 }
 0x194   :  { %v4322_v8 = vpop.eup %4321  ;;  %3916 = vst [vmem:[%s6982_s3 + $0x190] sm:$0xff] %v4320_v20  ;;  %4331 = vpow2.f32 %v4104_v38  ;;  %v4105_v59 = vmul.f32 -1.442695, %v3651_v39  ;;  %3153 = vrot.lane.b32.xlu0 %v2244_v15, %s4601_s0  ;;  %v6585_v16 = vpop.f32.mrf.mxu0 }
 0x195   :  { %4333 = vrcp.f32 %v3802_v41  ;;  %v3803_v57 = vadd.f32 1.0, %v4322_v8  ;;  %v2246_v28 = vpop.f32.mrf.mxu1 }
 0x196   :  { %4335 = vpow2.f32 %v4105_v59  ;;  %3155 = vrot.lane.b32.xlu1 %v2246_v28, %s4601_s0  ;;  %v2321_v2 = vpop.f32.mrf.mxu0 }
 0x197   :  { %4337 = vrcp.f32 %v3803_v57  ;;  %v3652_v10 = vadd.f32 %v6470_v17, %v2321_v2 }
 0x198   :  { %v4324_v24 = vpop.eup %4323  ;;  %v2323_v9 = vpop.f32.mrf.mxu0 }
 0x199   :  { %v4326_v29 = vpop.eup %4325  ;;  %v3804_v45 = vadd.f32 1.0, %v4324_v24  ;;  %v4106_v32 = vmul.f32 -1.442695, %v3652_v10  ;;  %v3653_v50 = vadd.f32 %v6470_v17, %v2323_v9 }
 0x19a   :  { %v4328_v49 = vpop.eup %4327  ;;  %3917 = vst [vmem:[%s6982_s3 + $0x198] sm:$0xff] %v4326_v29  ;;  %v2327_v21 = vpop.f32.mrf.mxu0 }
 0x19b   :  { %v6593_v51 = vpop.f32.mrf.mxu1  ;;  %v4330_v18 = vpop.eup %4329  ;;  %4339 = vrcp.f32 %v3804_v45  ;;  %v3805_v5 = vadd.f32 1.0, %v4328_v49  ;;  %v4107_v46 = vmul.f32 -1.442695, %v3653_v50  ;;  %3157 = vrot.lane.b32.xlu0 %v2327_v21, %s4601_s0 }
 0x19c   :  { %3918 = vst [vmem:[%s6982_s3 + $0x1a0] sm:$0xff] %v4330_v18  ;;  %4341 = vpow2.f32 %v4106_v32  ;;  %v2329_v42 = vpop.f32.mrf.mxu0 }
 0x19d   :  { %v6599_v54 = vpop.f32.mrf.mxu1  ;;  %4343 = vrcp.f32 %v3805_v5  ;;  %3159 = vrot.lane.b32.xlu1 %v2329_v42, %s4601_s0 }
 0x19e   :  { %4345 = vpow2.f32 %v4107_v46 }
 0x19f   :  { %v2404_v27 = vpop.f32.mrf.mxu1 }
 0x1a0   :  { %v3654_v25 = vadd.f32 %v6470_v17, %v2404_v27 }
 0x1a1   :  { %v4332_v35 = vpop.eup %4331  ;;  %v2406_v3 = vpop.f32.mrf.mxu1 }
 0x1a2   :  { %v4334_v6 = vpop.eup %4333  ;;  %v3806_v23 = vadd.f32 1.0, %v4332_v35  ;;  %v4108_v30 = vmul.f32 -1.442695, %v3654_v25  ;;  %v3655_v19 = vadd.f32 %v6470_v17, %v2406_v3  ;;  %v6607_v4 = vpop.f32.mrf.mxu0 }
 0x1a3   :  { %v4336_v62 = vpop.eup %4335  ;;  %3919 = vst [vmem:[%s6982_s3 + $0x1a8] sm:$0xff] %v4334_v6  ;;  %v2410_v44 = vpop.f32.mrf.mxu1 }
 0x1a4   :  { %v4338_v63 = vpop.eup %4337  ;;  %4347 = vrcp.f32 %v3806_v23  ;;  %v3807_v43 = vadd.f32 1.0, %v4336_v62  ;;  %v4109_v55 = vmul.f32 -1.442695, %v3655_v19  ;;  %3161 = vrot.lane.b32.xlu0 %v2410_v44, %s4601_s0  ;;  %v6613_v47 = vpop.f32.mrf.mxu0 }
 0x1a5   :  { %3920 = vst [vmem:[%s6982_s3 + $0x1b0] sm:$0xff] %v4338_v63  ;;  %4349 = vpow2.f32 %v4108_v30  ;;  %v2412_v37 = vpop.f32.mrf.mxu1 }
 0x1a6   :  { %4351 = vrcp.f32 %v3807_v43  ;;  %3163 = vrot.lane.b32.xlu1 %v2412_v37, %s4601_s0  ;;  %v2487_v38 = vpop.f32.mrf.mxu0 }
 0x1a7   :  { %4353 = vpow2.f32 %v4109_v55  ;;  %v3656_v39 = vadd.f32 %v6470_v17, %v2487_v38 }
 0x1a8   :  { %v4340_v20 = vpop.eup %4339  ;;  %v2489_v41 = vpop.f32.mrf.mxu0 }
 0x1a9   :  { %v4342_v15 = vpop.eup %4341  ;;  %3921 = vst [vmem:[%s6982_s3 + $0x1b8] sm:$0xff] %v4340_v20  ;;  %v4110_v8 = vmul.f32 -1.442695, %v3656_v39  ;;  %v3657_v59 = vadd.f32 %v6470_v17, %v2489_v41 }
 0x1aa   :  { %v4344_v57 = vpop.eup %4343  ;;  %v3808_v28 = vadd.f32 1.0, %v4342_v15  ;;  %v2493_v2 = vpop.f32.mrf.mxu0 }
 0x1ab   :  { %v6621_v10 = vpop.f32.mrf.mxu1  ;;  %v4346_v24 = vpop.eup %4345  ;;  %3922 = vst [vmem:[%s6982_s3 + $0x1c0] sm:$0xff] %v4344_v57  ;;  %4355 = vpow2.f32 %v4110_v8  ;;  %v4111_v9 = vmul.f32 -1.442695, %v3657_v59  ;;  %3165 = vrot.lane.b32.xlu0 %v2493_v2, %s4601_s0 }
 0x1ac   :  { %4357 = vrcp.f32 %v3808_v28  ;;  %v3809_v29 = vadd.f32 1.0, %v4346_v24  ;;  %v2495_v45 = vpop.f32.mrf.mxu0 }
 0x1ad   :  { %v6627_v32 = vpop.f32.mrf.mxu1  ;;  %4359 = vpow2.f32 %v4111_v9  ;;  %3167 = vrot.lane.b32.xlu1 %v2495_v45, %s4601_s0 }
 0x1ae   :  { %4361 = vrcp.f32 %v3809_v29 }
 0x1af   :  { %v2570_v50 = vpop.f32.mrf.mxu1 }
 0x1b0   :  { %v3658_v49 = vadd.f32 %v6470_v17, %v2570_v50 }
 0x1b1   :  { %v4348_v21 = vpop.eup %4347  ;;  %v2572_v18 = vpop.f32.mrf.mxu1 }
 0x1b2   :  { %v4350_v5 = vpop.eup %4349  ;;  %3923 = vst [vmem:[%s6982_s3 + $0x1c8] sm:$0xff] %v4348_v21  ;;  %v4112_v46 = vmul.f32 -1.442695, %v3658_v49  ;;  %v3659_v42 = vadd.f32 %v6470_v17, %v2572_v18  ;;  %v6635_v3 = vpop.f32.mrf.mxu0 }
 0x1b3   :  { %v4352_v27 = vpop.eup %4351  ;;  %v3810_v25 = vadd.f32 1.0, %v4350_v5  ;;  %v2576_v35 = vpop.f32.mrf.mxu1 }
 0x1b4   :  { %v4354_v6 = vpop.eup %4353  ;;  %3924 = vst [vmem:[%s6982_s3 + $0x1d0] sm:$0xff] %v4352_v27  ;;  %4363 = vpow2.f32 %v4112_v46  ;;  %v4113_v23 = vmul.f32 -1.442695, %v3659_v42  ;;  %3169 = vrot.lane.b32.xlu0 %v2576_v35, %s4601_s0  ;;  %v6641_v62 = vpop.f32.mrf.mxu0 }
 0x1b5   :  { %4365 = vrcp.f32 %v3810_v25  ;;  %v3811_v30 = vadd.f32 1.0, %v4354_v6  ;;  %v2578_v19 = vpop.f32.mrf.mxu1 }
 0x1b6   :  { %4367 = vpow2.f32 %v4113_v23  ;;  %3171 = vrot.lane.b32.xlu1 %v2578_v19, %s4601_s0  ;;  %v2653_v44 = vpop.f32.mrf.mxu0 }
 0x1b7   :  { %4369 = vrcp.f32 %v3811_v30  ;;  %v3660_v63 = vadd.f32 %v6470_v17, %v2653_v44 }
 0x1b8   :  { %v4356_v43 = vpop.eup %4355  ;;  %v2655_v55 = vpop.f32.mrf.mxu0 }
 0x1b9   :  { %v4358_v37 = vpop.eup %4357  ;;  %v3812_v38 = vadd.f32 1.0, %v4356_v43  ;;  %v4114_v39 = vmul.f32 -1.442695, %v3660_v63  ;;  %v3661_v20 = vadd.f32 %v6470_v17, %v2655_v55 }
 0x1ba   :  { %v4360_v41 = vpop.eup %4359  ;;  %3925 = vst [vmem:[%s6982_s3 + $0x1d8] sm:$0xff] %v4358_v37  ;;  %v2659_v15 = vpop.f32.mrf.mxu0 }
 0x1bb   :  { %v6649_v8 = vpop.f32.mrf.mxu1  ;;  %v4362_v59 = vpop.eup %4361  ;;  %4371 = vrcp.f32 %v3812_v38  ;;  %v3813_v57 = vadd.f32 1.0, %v4360_v41  ;;  %v4115_v28 = vmul.f32 -1.442695, %v3661_v20  ;;  %3173 = vrot.lane.b32.xlu0 %v2659_v15, %s4601_s0 }
 0x1bc   :  { %3926 = vst [vmem:[%s6982_s3 + $0x1e0] sm:$0xff] %v4362_v59  ;;  %4373 = vpow2.f32 %v4114_v39  ;;  %v3118_v2 = vpop.permute.xlu1 %3117  ;;  %v2661_v24 = vpop.f32.mrf.mxu0 }
 0x1bd   :  { %4375 = vrcp.f32 %v3813_v57  ;;  %v3273_v9 = vsel %vm3195_vm5, 0.0, %v3118_v2  ;;  %v6656_v29 = vpop.f32.mrf.mxu1  ;;  %3175 = vrot.lane.b32.xlu1 %v2661_v24, %s4601_s0 }
 0x1be   :  { %4377 = vpow2.f32 %v4115_v28  ;;  %v3274_v45 = vadd.f32 %v3273_v9, %v6466_v0 }
 0x1bf   :  { %v2736_v50 = vpop.f32.mrf.mxu1 }
 0x1c0   :  { %v3319_v21 = vadd.f32 %v6470_v17, %v3274_v45  ;;  %v3662_v18 = vadd.f32 %v6470_v17, %v2736_v50  ;;  %v3120_v5 = vpop.permute.xlu1 %3119 }
 0x1c1   :  { %v4364_v49 = vpop.eup %4363  ;;  %v3196_v27 = vsel %vm3195_vm5, %v3118_v2, %v3120_v5  ;;  %v2738_v25 = vpop.f32.mrf.mxu1 }
 0x1c2   :  { %v4366_v46 = vpop.eup %4365  ;;  %v3814_v42 = vadd.f32 1.0, %v4364_v49  ;;  %v4047_v6 = vmul.f32 -1.442695, %v3319_v21  ;;  %v4116_v23 = vmul.f32 -1.442695, %v3662_v18  ;;  %v3275_v0 = vadd.f32 %v3196_v27, %v6468_v13  ;;  %v6668_v19 = vpop.f32.mrf.mxu0 }
 0x1c3   :  { %v4368_v35 = vpop.eup %4367  ;;  %3927 = vst [vmem:[%s6982_s3 + $0x1e8] sm:$0xff] %v4366_v46  ;;  %v3663_v30 = vadd.f32 %v6470_v17, %v2738_v25  ;;  %v2742_v43 = vpop.f32.mrf.mxu1 }
 0x1c4   :  { %v4370_v44 = vpop.eup %4369  ;;  %4379 = vrcp.f32 %v3814_v42  ;;  %v3815_v63 = vadd.f32 1.0, %v4368_v35  ;;  %v3320_v55 = vadd.f32 %v6470_v17, %v3275_v0  ;;  %3177 = vrot.lane.b32.xlu0 %v2742_v43, %s4601_s0  ;;  %v6675_v38 = vpop.f32.mrf.mxu0 }
 0x1c5   :  { %3928 = vst [vmem:[%s6982_s3 + $0x1f0] sm:$0xff] %v4370_v44  ;;  %4381 = vpow2.f32 %v4047_v6  ;;  %v4117_v37 = vmul.f32 -1.442695, %v3663_v30  ;;  %v2744_v13 = vpop.f32.mrf.mxu1 }
 0x1c6   :  { %4383 = vrcp.f32 %v3815_v63  ;;  %v4048_v39 = vmul.f32 -1.442695, %v3320_v55  ;;  %3179 = vrot.lane.b32.xlu1 %v2744_v13, %s4601_s0  ;;  %v3122_v20 = vpop.permute.xlu0 %3121  ;;  %v2819_v41 = vpop.f32.mrf.mxu0 }
 0x1c7   :  { %4385 = vpow2.f32 %v4116_v23  ;;  %v3197_v15 = vsel %vm3195_vm5, %v3120_v5, %v3122_v20  ;;  %v3664_v59 = vadd.f32 %v6470_v17, %v2819_v41 }
 0x1c8   :  { %4387 = vpow2.f32 %v4117_v37  ;;  %v4372_v57 = vpop.eup %4371  ;;  %v3276_v28 = vadd.f32 %v3197_v15, %v6475_v1  ;;  %v3124_v2 = vpop.permute.xlu1 %3123 }
 0x1c9   :  { %4389 = vpow2.f32 %v4048_v39  ;;  %v2821_v24 = vpop.f32.mrf.mxu0  ;;  %v4374_v9 = vpop.eup %4373  ;;  %3929 = vst [vmem:[%s6982_s3 + $0x1f8] sm:$0xff] %v4372_v57  ;;  %v4118_v45 = vmul.f32 -1.442695, %v3664_v59  ;;  %v3198_v50 = vsel %vm3195_vm5, %v3122_v20, %v3124_v2 }
 0x1ca   :  { %v3665_v49 = vadd.f32 %v6470_v17, %v2821_v24  ;;  %v4376_v21 = vpop.eup %4375  ;;  %v3816_v18 = vadd.f32 1.0, %v4374_v9  ;;  %v3321_v5 = vadd.f32 %v6470_v17, %v3276_v28  ;;  %v3277_v46 = vadd.f32 %v3198_v50, %v6477_v12  ;;  %v6688_v1 = vpop.f32.mrf.mxu1 }
 0x1cb   :  { %v2825_v42 = vpop.f32.mrf.mxu0  ;;  %v4378_v27 = vpop.eup %4377  ;;  %3930 = vst [vmem:[%s6982_s3 + $0x200] sm:$0xff] %v4376_v21  ;;  %4391 = vpow2.f32 %v4118_v45 }
 0x1cc   :  { %v4119_v25 = vmul.f32 -1.442695, %v3665_v49  ;;  %3181 = vrot.lane.b32.xlu0 %v2825_v42, %s4601_s0  ;;  %4393 = vrcp.f32 %v3816_v18  ;;  %v3817_v35 = vadd.f32 1.0, %v4378_v27  ;;  %v4049_v6 = vmul.f32 -1.442695, %v3321_v5  ;;  %v6695_v30 = vpop.f32.mrf.mxu1 }
 0x1cd   :  { %v3322_v23 = vadd.f32 %v6470_v17, %v3277_v46  ;;  %v2827_v0 = vpop.f32.mrf.mxu0 }
 0x1ce   :  { %4395 = vpow2.f32 %v4119_v25  ;;  %3183 = vrot.lane.b32.xlu1 %v2827_v0, %s4601_s0  ;;  %v3126_v44 = vpop.permute.xlu0 %3125  ;;  %v2902_v63 = vpop.f32.mrf.mxu1 }
 0x1cf   :  { %4397 = vrcp.f32 %v3817_v35  ;;  %v4050_v12 = vmul.f32 -1.442695, %v3322_v23  ;;  %v3199_v43 = vsel %vm3195_vm5, %v3124_v2, %v3126_v44  ;;  %v3666_v55 = vadd.f32 %v6470_v17, %v2902_v63 }
 0x1d0   :  { %4399 = vpow2.f32 %v4049_v6  ;;  %v3278_v13 = vadd.f32 %v3199_v43, %v6482_v61  ;;  %v3128_v39 = vpop.permute.xlu1 %3127  ;;  %v2904_v20 = vpop.f32.mrf.mxu1 }
 0x1d1   :  { %v4380_v37 = vpop.eup %4379  ;;  %4401 = vpow2.f32 %v4050_v12  ;;  %v4120_v15 = vmul.f32 -1.442695, %v3666_v55  ;;  %v3200_v59 = vsel %vm3195_vm5, %v3126_v44, %v3128_v39  ;;  %v3667_v57 = vadd.f32 %v6470_v17, %v2904_v20 }
 0x1d2   :  { %v4382_v41 = vpop.eup %4381  ;;  %3931 = vst [vmem:[%s6982_s3 + $0x208] sm:$0xff] %v4380_v37  ;;  %v3323_v24 = vadd.f32 %v6470_v17, %v3278_v13  ;;  %v3279_v9 = vadd.f32 %v3200_v59, %v6485_v7  ;;  %v2908_v45 = vpop.f32.mrf.mxu1 }
 0x1d3   :  { %v4384_v28 = vpop.eup %4383  ;;  %v3475_v2 = vadd.f32 1.0, %v4382_v41  ;;  %v6708_v61 = vpop.f32.mrf.mxu0  ;;  %4403 = vpow2.f32 %v4120_v15  ;;  %v4121_v49 = vmul.f32 -1.442695, %v3667_v57  ;;  %3185 = vrot.lane.b32.xlu0 %v2908_v45, %s4601_s0 }
 0x1d4   :  { %v4386_v50 = vpop.eup %4385  ;;  %3932 = vst [vmem:[%s6982_s3 + $0x210] sm:$0xff] %v4384_v28  ;;  %v3324_v5 = vadd.f32 %v6470_v17, %v3279_v9  ;;  %v2910_v46 = vpop.f32.mrf.mxu1  ;;  %v4051_v25 = vmul.f32 -1.442695, %v3323_v24 }
 0x1d5   :  { %v4388_v21 = vpop.eup %4387  ;;  %4405 = vrcp.f32 %v3475_v2  ;;  %v3818_v18 = vadd.f32 1.0, %v4386_v50  ;;  %v6715_v42 = vpop.f32.mrf.mxu0  ;;  %3187 = vrot.lane.b32.xlu1 %v2910_v46, %s4601_s0 }
 0x1d6   :  { %v4390_v7 = vpop.eup %4389  ;;  %v3819_v27 = vadd.f32 1.0, %v4388_v21  ;;  %4407 = vpow2.f32 %v4121_v49  ;;  %v4052_v6 = vmul.f32 -1.442695, %v3324_v5  ;;  %v3130_v23 = vpop.permute.xlu0 %3129 }
 0x1d7   :  { %4409 = vrcp.f32 %v3818_v18  ;;  %v3476_v35 = vadd.f32 1.0, %v4390_v7  ;;  %v2985_v0 = vpop.f32.mrf.mxu0  ;;  %v3201_v12 = vsel %vm3195_vm5, %v3128_v39, %v3130_v23  ;;  %v3062_v63 = vpop.f32.mrf.mxu1 }
 0x1d8   :  { %4411 = vrcp.f32 %v3819_v27  ;;  %v3668_v44 = vadd.f32 %v6470_v17, %v2985_v0  ;;  %v4392_v43 = vpop.eup %4391  ;;  %v3280_v55 = vadd.f32 %v3201_v12, %v6490_v40  ;;  %v6722_v37 = vsel %vm3076_vm9, %v3062_v63, 0.0  ;;  %v3132_v13 = vpop.permute.xlu1 %3131 }
 0x1d9   :  { %4413 = vrcp.f32 %v3476_v35  ;;  %v2987_v20 = vpop.f32.mrf.mxu0  ;;  %v4394_v41 = vpop.eup %4393  ;;  %v3820_v15 = vadd.f32 1.0, %v4392_v43  ;;  %v3202_v57 = vsel %vm3195_vm5, %v3130_v23, %v3132_v13 }
 0x1da   :  { %4415 = vpow2.f32 %v4051_v25  ;;  %v4122_v59 = vmul.f32 -1.442695, %v3668_v44  ;;  %v4136_v28 = vpop.f32.mrf.mxu1  ;;  %3933 = vst [vmem:[%s6982_s3 + $0x218] sm:$0xff] %v4394_v41  ;;  %v3325_v40 = vadd.f32 %v6470_v17, %v3280_v55  ;;  %v3281_v2 = vadd.f32 %v3202_v57, %v6493_v31 }
 0x1db   :  { %v4396_v39 = vpop.eup %4395  ;;  %4417 = vpow2.f32 %v4052_v6  ;;  %v3669_v24 = vadd.f32 %v6470_v17, %v2987_v20  ;;  %v2991_v9 = vpop.f32.mrf.mxu0 }
 0x1dc   :  { %v4398_v45 = vpop.eup %4397  ;;  %4419 = vrcp.f32 %v3820_v15  ;;  %v3821_v50 = vadd.f32 1.0, %v4396_v39  ;;  %v3067_v49 = vpop.f32.mrf.mxu1  ;;  %3189 = vrot.lane.b32.xlu0 %v2991_v9, %s4601_s0  ;;  %v4053_v18 = vmul.f32 -1.442695, %v3325_v40  ;;  %v3326_v5 = vadd.f32 %v6470_v17, %v3281_v2 }
 0x1dd   :  { %v4400_v21 = vpop.eup %4399  ;;  %3934 = vst [vmem:[%s6982_s3 + $0x220] sm:$0xff] %v4398_v45  ;;  %4421 = vpow2.f32 %v4122_v59  ;;  %v2993_v46 = vpop.f32.mrf.mxu0  ;;  %v4123_v27 = vmul.f32 -1.442695, %v3669_v24  ;;  %v3313_v25 = vsel %vm3076_vm9, %v3067_v49, 0.0 }
 0x1de   :  { %v4402_v31 = vpop.eup %4401  ;;  %v3477_v7 = vadd.f32 1.0, %v4400_v21  ;;  %4423 = vrcp.f32 %v3821_v50  ;;  %v4139_v35 = vpop.f32.mrf.mxu1  ;;  %3191 = vrot.lane.b32.xlu1 %v2993_v46, %s4601_s0  ;;  %v4054_v0 = vmul.f32 -1.442695, %v3326_v5  ;;  %v3670_v12 = vadd.f32 %v6470_v17, %v3313_v25 }
 0x1df   :  { %v3134_v6 = vpop.permute.xlu0 %3133  ;;  %v3478_v23 = vadd.f32 1.0, %v4402_v31  ;;  %4425 = vpow2.f32 %v4053_v18  ;;  %v3136_v43 = vpop.permute.xlu1 %3135 }
 0x1e0   :  { %4427 = vrcp.f32 %v3477_v7  ;;  %v3203_v44 = vsel %vm3195_vm5, %v3132_v13, %v3134_v6  ;;  %v3072_v63 = vpop.f32.mrf.mxu1  ;;  %v4404_v55 = vpop.eup %4403  ;;  %v4124_v20 = vmul.f32 -1.442695, %v3670_v12  ;;  %v3204_v15 = vsel %vm3195_vm5, %v3134_v6, %v3136_v43 }
 0x1e1   :  { %4429 = vrcp.f32 %v3478_v23  ;;  %v3282_v41 = vadd.f32 %v3203_v44, %v6497_v52  ;;  %3193 = vrot.lane.b32.xlu0 %v3072_v63, %s4601_s0  ;;  %v3822_v57 = vadd.f32 1.0, %v4404_v55  ;;  %v3283_v28 = vadd.f32 %v3204_v15, %v6501_v34 }
 0x1e2   :  { %v4406_v59 = vpop.eup %4405  ;;  %4431 = vpow2.f32 %v4054_v0  ;;  %v4142_v39 = vpop.f32.mrf.mxu1 }
 0x1e3   :  { %v4408_v40 = vpop.eup %4407  ;;  %3592 = vst [vmem:[%s6982_s3] sm:$0xff] %v4406_v59  ;;  %4433 = vpow2.f32 %v4123_v27  ;;  %v3327_v13 = vadd.f32 %v6470_v17, %v3282_v41  ;;  %v3328_v24 = vadd.f32 %v6470_v17, %v3283_v28 }
 0x1e4   :  { %v4410_v2 = vpop.eup %4409  ;;  %4435 = vrcp.f32 %v3822_v57  ;;  %v3823_v52 = vadd.f32 1.0, %v4408_v40 }
 0x1e5   :  { %v4412_v9 = vpop.eup %4411  ;;  %3935 = vst [vmem:[%s6982_s3 + $0x228] sm:$0xff] %v4410_v2  ;;  %4437 = vpow2.f32 %v4124_v20  ;;  %v4055_v34 = vmul.f32 -1.442695, %v3327_v13  ;;  %v4056_v50 = vmul.f32 -1.442695, %v3328_v24 }
 0x1e6   :  { %v4414_v45 = vpop.eup %4413  ;;  %3936 = vst [vmem:[%s6982_s3 + $0x230] sm:$0xff] %v4412_v9  ;;  %4439 = vrcp.f32 %v3823_v52  ;;  %v3138_v49 = vpop.permute.xlu0 %3137 }
 0x1e7   :  { %v4416_v21 = vpop.eup %4415  ;;  %3593 = vst [vmem:[%s6982_s3 + $0x8] sm:$0xff] %v4414_v45  ;;  %4441 = vpow2.f32 %v4055_v34  ;;  %v3205_v18 = vsel %vm3195_vm5, %v3136_v43, %v3138_v49 }
 0x1e8   :  { %v4418_v5 = vpop.eup %4417  ;;  %v3479_v46 = vadd.f32 1.0, %v4416_v21  ;;  %4443 = vpow2.f32 %v4056_v50  ;;  %v3284_v31 = vadd.f32 %v3205_v18, %v6509_v22  ;;  %v3140_v7 = vpop.permute.xlu1 %3139 }
 0x1e9   :  { %v4420_v27 = vpop.eup %4419  ;;  %v3480_v25 = vadd.f32 1.0, %v4418_v5  ;;  %v3206_v35 = vsel %vm3195_vm5, %v3138_v49, %v3140_v7 }
 0x1ea   :  { %v4422_v6 = vpop.eup %4421  ;;  %3937 = vst [vmem:[%s6982_s3 + $0x238] sm:$0xff] %v4420_v27  ;;  %4445 = vrcp.f32 %v3479_v46  ;;  %v3329_v23 = vadd.f32 %v6470_v17, %v3284_v31  ;;  %v3285_v0 = vadd.f32 %v3206_v35, %v6515_v26 }
 0x1eb   :  { %v4424_v12 = vpop.eup %4423  ;;  %4447 = vrcp.f32 %v3480_v25  ;;  %v3824_v44 = vadd.f32 1.0, %v4422_v6 }
 0x1ec   :  { %v4426_v63 = vpop.eup %4425  ;;  %3938 = vst [vmem:[%s6982_s3 + $0x240] sm:$0xff] %v4424_v12  ;;  %v4057_v22 = vmul.f32 -1.442695, %v3329_v23  ;;  %v3330_v43 = vadd.f32 %v6470_v17, %v3285_v0 }
 0x1ed   :  { %v4428_v55 = vpop.eup %4427  ;;  %v3481_v20 = vadd.f32 1.0, %v4426_v63  ;;  %4449 = vrcp.f32 %v3824_v44  ;;  %v3142_v15 = vpop.permute.xlu0 %3141 }
 0x1ee   :  { %v4430_v41 = vpop.eup %4429  ;;  %3594 = vst [vmem:[%s6982_s3 + $0x10] sm:$0xff] %v4428_v55  ;;  %4451 = vpow2.f32 %v4057_v22  ;;  %v4058_v26 = vmul.f32 -1.442695, %v3330_v43  ;;  %v3207_v57 = vsel %vm3195_vm5, %v3140_v7, %v3142_v15 }
 0x1ef   :  { %v4432_v59 = vpop.eup %4431  ;;  %3595 = vst [vmem:[%s6982_s3 + $0x18] sm:$0xff] %v4430_v41  ;;  %4453 = vrcp.f32 %v3481_v20  ;;  %v3286_v40 = vadd.f32 %v3207_v57, %v6520_v11  ;;  %v3144_v13 = vpop.permute.xlu1 %3143 }
 0x1f0   :  { %v4434_v28 = vpop.eup %4433  ;;  %v3482_v39 = vadd.f32 1.0, %v4432_v59  ;;  %4455 = vpow2.f32 %v4058_v26  ;;  %v3208_v24 = vsel %vm3195_vm5, %v3142_v15, %v3144_v13 }
 0x1f1   :  { %v4436_v2 = vpop.eup %4435  ;;  %v3825_v52 = vadd.f32 1.0, %v4434_v28  ;;  %v3331_v34 = vadd.f32 %v6470_v17, %v3286_v40  ;;  %v3287_v45 = vadd.f32 %v3208_v24, %v6526_v14 }
 0x1f2   :  { %v4438_v9 = vpop.eup %4437  ;;  %3939 = vst [vmem:[%s6982_s3 + $0x248] sm:$0xff] %v4436_v2  ;;  %4457 = vrcp.f32 %v3482_v39 }
 0x1f3   :  { %v4440_v50 = vpop.eup %4439  ;;  %4459 = vrcp.f32 %v3825_v52  ;;  %v3826_v49 = vadd.f32 1.0, %v4438_v9  ;;  %v4059_v11 = vmul.f32 -1.442695, %v3331_v34  ;;  %v3332_v18 = vadd.f32 %v6470_v17, %v3287_v45 }
 0x1f4   :  { %v4442_v21 = vpop.eup %4441  ;;  %3940 = vst [vmem:[%s6982_s3 + $0x250] sm:$0xff] %v4440_v50 }
 0x1f5   :  { %v4444_v5 = vpop.eup %4443  ;;  %4461 = vrcp.f32 %v3826_v49  ;;  %v3483_v46 = vadd.f32 1.0, %v4442_v21  ;;  %v4060_v7 = vmul.f32 -1.442695, %v3332_v18 }
 0x1f6   :  { %v3484_v31 = vadd.f32 1.0, %v4444_v5  ;;  %4463 = vpow2.f32 %v4059_v11  ;;  %v3146_v27 = vpop.permute.xlu0 %3145 }
 0x1f7   :  { %v4446_v25 = vpop.eup %4445  ;;  %4465 = vrcp.f32 %v3483_v46  ;;  %v3209_v14 = vsel %vm3195_vm5, %v3144_v13, %v3146_v27 }
 0x1f8   :  { %v4448_v35 = vpop.eup %4447  ;;  %3596 = vst [vmem:[%s6982_s3 + $0x20] sm:$0xff] %v4446_v25  ;;  %4467 = vrcp.f32 %v3484_v31  ;;  %v3288_v6 = vadd.f32 %v3209_v14, %v6537_v53  ;;  %v3148_v23 = vpop.permute.xlu1 %3147 }
 0x1f9   :  { %3597 = vst [vmem:[%s6982_s3 + $0x28] sm:$0xff] %v4448_v35  ;;  %4469 = vpow2.f32 %v4060_v7  ;;  %v3210_v0 = vsel %vm3195_vm5, %v3146_v27, %v3148_v23 }
 0x1fa   :  { %v4450_v12 = vpop.eup %4449  ;;  %v3333_v44 = vadd.f32 %v6470_v17, %v3288_v6  ;;  %v3289_v63 = vadd.f32 %v3210_v0, %v6543_v58 }
 0x1fb   :  { %v4452_v22 = vpop.eup %4451  ;;  %3941 = vst [vmem:[%s6982_s3 + $0x258] sm:$0xff] %v4450_v12 }
 0x1fc   :  { %v4454_v43 = vpop.eup %4453  ;;  %v3485_v53 = vadd.f32 1.0, %v4452_v22  ;;  %v4061_v55 = vmul.f32 -1.442695, %v3333_v44  ;;  %v3334_v20 = vadd.f32 %v6470_v17, %v3289_v63 }
 0x1fd   :  { %v4456_v41 = vpop.eup %4455  ;;  %3598 = vst [vmem:[%s6982_s3 + $0x30] sm:$0xff] %v4454_v43  ;;  %v3150_v59 = vpop.permute.xlu0 %3149 }
 0x1fe   :  { %4471 = vrcp.f32 %v3485_v53  ;;  %v3486_v26 = vadd.f32 1.0, %v4456_v41  ;;  %v4062_v15 = vmul.f32 -1.442695, %v3334_v20  ;;  %v3211_v57 = vsel %vm3195_vm5, %v3148_v23, %v3150_v59 }
 0x1ff   :  { %v4458_v58 = vpop.eup %4457  ;;  %4473 = vpow2.f32 %v4061_v55  ;;  %v3290_v39 = vadd.f32 %v3211_v57, %v6551_v48  ;;  %v3152_v40 = vpop.permute.xlu1 %3151 }
 0x200   :  { %v4460_v28 = vpop.eup %4459  ;;  %3599 = vst [vmem:[%s6982_s3 + $0x38] sm:$0xff] %v4458_v58  ;;  %4475 = vrcp.f32 %v3486_v26  ;;  %v3212_v13 = vsel %vm3195_vm5, %v3150_v59, %v3152_v40 }
 0x201   :  { %3942 = vst [vmem:[%s6982_s3 + $0x260] sm:$0xff] %v4460_v28  ;;  %4477 = vpow2.f32 %v4062_v15  ;;  %v3335_v52 = vadd.f32 %v6470_v17, %v3290_v39  ;;  %v3291_v24 = vadd.f32 %v3212_v13, %v6557_v33 }
 0x202   :  { %v4462_v2 = vpop.eup %4461 }
 0x203   :  { %v4464_v9 = vpop.eup %4463  ;;  %3943 = vst.msk [vmem:[%s6982_s3 + $0x268] sm:$0xff] %vm3630_vm8, %v4462_v2  ;;  %v4063_v45 = vmul.f32 -1.442695, %v3335_v52  ;;  %v3336_v50 = vadd.f32 %v6470_v17, %v3291_v24 }
 0x204   :  { %v4466_v48 = vpop.eup %4465  ;;  %v3487_v34 = vadd.f32 1.0, %v4464_v9 }
 0x205   :  { %v4468_v49 = vpop.eup %4467  ;;  %3600 = vst [vmem:[%s6982_s3 + $0x40] sm:$0xff] %v4466_v48  ;;  %v4064_v33 = vmul.f32 -1.442695, %v3336_v50 }
 0x206   :  { %v4470_v21 = vpop.eup %4469  ;;  %3601 = vst [vmem:[%s6982_s3 + $0x48] sm:$0xff] %v4468_v49  ;;  %4479 = vrcp.f32 %v3487_v34  ;;  %v3154_v11 = vpop.permute.xlu0 %3153 }
 0x207   :  { %v3488_v18 = vadd.f32 1.0, %v4470_v21  ;;  %4481 = vpow2.f32 %v4063_v45  ;;  %v3213_v5 = vsel %vm3195_vm5, %v3152_v40, %v3154_v11 }
 0x208   :  { %4483 = vpow2.f32 %v4064_v33  ;;  %v3292_v46 = vadd.f32 %v3213_v5, %v6565_v36  ;;  %v3156_v31 = vpop.permute.xlu1 %3155 }
 0x209   :  { %4485 = vrcp.f32 %v3488_v18  ;;  %v3214_v7 = vsel %vm3195_vm5, %v3154_v11, %v3156_v31 }
 0x20a   :  { %v3337_v27 = vadd.f32 %v6470_v17, %v3292_v46  ;;  %v3293_v25 = vadd.f32 %v3214_v7, %v6571_v56 }
 0x20b   :  { %v4472_v14 = vpop.eup %4471 }
 0x20c   :  { %v4474_v35 = vpop.eup %4473  ;;  %3602 = vst [vmem:[%s6982_s3 + $0x50] sm:$0xff] %v4472_v14  ;;  %v4065_v6 = vmul.f32 -1.442695, %v3337_v27  ;;  %v3338_v23 = vadd.f32 %v6470_v17, %v3293_v25 }
 0x20d   :  { %v4476_v0 = vpop.eup %4475  ;;  %v3489_v12 = vadd.f32 1.0, %v4474_v35  ;;  %v3158_v63 = vpop.permute.xlu0 %3157 }
 0x20e   :  { %v4478_v36 = vpop.eup %4477  ;;  %3603 = vst [vmem:[%s6982_s3 + $0x58] sm:$0xff] %v4476_v0  ;;  %4487 = vpow2.f32 %v4065_v6  ;;  %v4066_v44 = vmul.f32 -1.442695, %v3338_v23  ;;  %v3215_v22 = vsel %vm3195_vm5, %v3156_v31, %v3158_v63 }
 0x20f   :  { %4489 = vrcp.f32 %v3489_v12  ;;  %v3490_v56 = vadd.f32 1.0, %v4478_v36  ;;  %v3294_v43 = vadd.f32 %v3215_v22, %v6579_v60  ;;  %v3160_v53 = vpop.permute.xlu1 %3159 }
 0x210   :  { %4491 = vpow2.f32 %v4066_v44  ;;  %v3216_v55 = vsel %vm3195_vm5, %v3158_v63, %v3160_v53 }
 0x211   :  { %4493 = vrcp.f32 %v3490_v56  ;;  %v3339_v20 = vadd.f32 %v6470_v17, %v3294_v43  ;;  %v3295_v41 = vadd.f32 %v3216_v55, %v6585_v16 }
 0x213   :  { %v4480_v26 = vpop.eup %4479  ;;  %v4067_v59 = vmul.f32 -1.442695, %v3339_v20  ;;  %v3340_v58 = vadd.f32 %v6470_v17, %v3295_v41 }
 0x214   :  { %v4482_v15 = vpop.eup %4481  ;;  %3604 = vst [vmem:[%s6982_s3 + $0x60] sm:$0xff] %v4480_v26 }
 0x215   :  { %v4484_v57 = vpop.eup %4483  ;;  %v3491_v28 = vadd.f32 1.0, %v4482_v15  ;;  %4495 = vpow2.f32 %v4067_v59  ;;  %v4068_v40 = vmul.f32 -1.442695, %v3340_v58 }
 0x216   :  { %v4486_v60 = vpop.eup %4485  ;;  %v3492_v39 = vadd.f32 1.0, %v4484_v57  ;;  %v3162_v13 = vpop.permute.xlu0 %3161 }
 0x217   :  { %3605 = vst [vmem:[%s6982_s3 + $0x68] sm:$0xff] %v4486_v60  ;;  %4497 = vrcp.f32 %v3491_v28  ;;  %v3217_v16 = vsel %vm3195_vm5, %v3160_v53, %v3162_v13 }
 0x218   :  { %4499 = vrcp.f32 %v3492_v39  ;;  %v3296_v2 = vadd.f32 %v3217_v16, %v6593_v51  ;;  %v3164_v52 = vpop.permute.xlu1 %3163 }
 0x219   :  { %4501 = vpow2.f32 %v4068_v40  ;;  %v3218_v24 = vsel %vm3195_vm5, %v3162_v13, %v3164_v52 }
 0x21a   :  { %v3341_v9 = vadd.f32 %v6470_v17, %v3296_v2  ;;  %v3297_v48 = vadd.f32 %v3218_v24, %v6599_v54 }
 0x21b   :  { %v4488_v34 = vpop.eup %4487 }
 0x21c   :  { %v4490_v45 = vpop.eup %4489  ;;  %v3493_v50 = vadd.f32 1.0, %v4488_v34  ;;  %v4069_v49 = vmul.f32 -1.442695, %v3341_v9  ;;  %v3342_v21 = vadd.f32 %v6470_v17, %v3297_v48 }
 0x21d   :  { %v4492_v33 = vpop.eup %4491  ;;  %3606 = vst [vmem:[%s6982_s3 + $0x70] sm:$0xff] %v4490_v45  ;;  %v3166_v5 = vpop.permute.xlu0 %3165 }
 0x21e   :  { %v4494_v51 = vpop.eup %4493  ;;  %4503 = vrcp.f32 %v3493_v50  ;;  %v3494_v11 = vadd.f32 1.0, %v4492_v33  ;;  %v4070_v18 = vmul.f32 -1.442695, %v3342_v21  ;;  %v3219_v54 = vsel %vm3195_vm5, %v3164_v52, %v3166_v5 }
 0x21f   :  { %3607 = vst [vmem:[%s6982_s3 + $0x78] sm:$0xff] %v4494_v51  ;;  %4505 = vpow2.f32 %v4069_v49  ;;  %v3298_v46 = vadd.f32 %v3219_v54, %v6607_v4  ;;  %v3168_v31 = vpop.permute.xlu1 %3167 }
 0x220   :  { %4507 = vrcp.f32 %v3494_v11  ;;  %v3220_v7 = vsel %vm3195_vm5, %v3166_v5, %v3168_v31 }
 0x221   :  { %4509 = vpow2.f32 %v4070_v18  ;;  %v3343_v27 = vadd.f32 %v6470_v17, %v3298_v46  ;;  %v3299_v25 = vadd.f32 %v3220_v7, %v6613_v47 }
 0x222   :  { %v4496_v14 = vpop.eup %4495 }
 0x223   :  { %v3495_v6 = vadd.f32 1.0, %v4496_v14  ;;  %v4071_v23 = vmul.f32 -1.442695, %v3343_v27  ;;  %v3344_v0 = vadd.f32 %v6470_v17, %v3299_v25 }
 0x224   :  { %v4498_v35 = vpop.eup %4497 }
 0x225   :  { %v4500_v12 = vpop.eup %4499  ;;  %3608 = vst [vmem:[%s6982_s3 + $0x80] sm:$0xff] %v4498_v35  ;;  %4511 = vrcp.f32 %v3495_v6  ;;  %v4072_v36 = vmul.f32 -1.442695, %v3344_v0 }
 0x226   :  { %v4502_v4 = vpop.eup %4501  ;;  %3609 = vst [vmem:[%s6982_s3 + $0x88] sm:$0xff] %v4500_v12  ;;  %v3170_v44 = vpop.permute.xlu0 %3169  ;;  %4513 = vpow2.f32 %v4071_v23 }
 0x227   :  { %v3496_v47 = vadd.f32 1.0, %v4502_v4  ;;  %v3221_v63 = vsel %vm3195_vm5, %v3168_v31, %v3170_v44  ;;  %4515 = vpow2.f32 %v4072_v36 }
 0x228   :  { %v3300_v56 = vadd.f32 %v3221_v63, %v6621_v10  ;;  %v3172_v22 = vpop.permute.xlu1 %3171 }
 0x229   :  { %4517 = vrcp.f32 %v3496_v47  ;;  %v3222_v43 = vsel %vm3195_vm5, %v3170_v44, %v3172_v22 }
 0x22a   :  { %v3345_v53 = vadd.f32 %v6470_v17, %v3300_v56  ;;  %v3301_v55 = vadd.f32 %v3222_v43, %v6627_v32 }
 0x22b   :  { %v4504_v20 = vpop.eup %4503 }
 0x22c   :  { %v4506_v41 = vpop.eup %4505  ;;  %3610 = vst [vmem:[%s6982_s3 + $0x90] sm:$0xff] %v4504_v20  ;;  %v4073_v26 = vmul.f32 -1.442695, %v3345_v53  ;;  %v3346_v15 = vadd.f32 %v6470_v17, %v3301_v55 }
 0x22d   :  { %v4508_v59 = vpop.eup %4507  ;;  %v3497_v58 = vadd.f32 1.0, %v4506_v41  ;;  %v3174_v28 = vpop.permute.xlu0 %3173 }
 0x22e   :  { %v4510_v10 = vpop.eup %4509  ;;  %3611 = vst [vmem:[%s6982_s3 + $0x98] sm:$0xff] %v4508_v59  ;;  %4519 = vpow2.f32 %v4073_v26  ;;  %v4074_v57 = vmul.f32 -1.442695, %v3346_v15  ;;  %v3223_v60 = vsel %vm3195_vm5, %v3172_v22, %v3174_v28 }
 0x22f   :  { %4521 = vrcp.f32 %v3497_v58  ;;  %v3498_v32 = vadd.f32 1.0, %v4510_v10  ;;  %v3302_v39 = vadd.f32 %v3223_v60, %v6635_v3  ;;  %v3176_v40 = vpop.permute.xlu1 %3175 }
 0x230   :  { %4523 = vpow2.f32 %v4074_v57  ;;  %v3224_v13 = vsel %vm3195_vm5, %v3174_v28, %v3176_v40 }
 0x231   :  { %4525 = vrcp.f32 %v3498_v32  ;;  %v3347_v16 = vadd.f32 %v6470_v17, %v3302_v39  ;;  %v3303_v2 = vadd.f32 %v3224_v13, %v6641_v62 }
 0x232   :  { %v4512_v52 = vpop.eup %4511 }
 0x233   :  { %v4514_v24 = vpop.eup %4513  ;;  %3612 = vst [vmem:[%s6982_s3 + $0xa0] sm:$0xff] %v4512_v52  ;;  %v4075_v9 = vmul.f32 -1.442695, %v3347_v16  ;;  %v3348_v48 = vadd.f32 %v6470_v17, %v3303_v2 }
 0x234   :  { %v4516_v34 = vpop.eup %4515  ;;  %v3499_v45 = vadd.f32 1.0, %v4514_v24 }
 0x235   :  { %v3500_v50 = vadd.f32 1.0, %v4516_v34  ;;  %4527 = vpow2.f32 %v4075_v9  ;;  %v4076_v49 = vmul.f32 -1.442695, %v3348_v48 }
 0x236   :  { %v4518_v3 = vpop.eup %4517  ;;  %4529 = vrcp.f32 %v3499_v45  ;;  %v3178_v62 = vpop.permute.xlu0 %3177 }
 0x237   :  { %3613 = vst [vmem:[%s6982_s3 + $0xa8] sm:$0xff] %v4518_v3  ;;  %4531 = vrcp.f32 %v3500_v50  ;;  %v3225_v21 = vsel %vm3195_vm5, %v3176_v40, %v3178_v62 }
 0x238   :  { %4533 = vpow2.f32 %v4076_v49  ;;  %v3304_v33 = vadd.f32 %v3225_v21, %v6649_v8  ;;  %v3180_v51 = vpop.permute.xlu1 %3179 }
 0x239   :  { %v3226_v11 = vsel %vm3195_vm5, %v3178_v62, %v3180_v51 }
 0x23a   :  { %v3349_v5 = vadd.f32 %v6470_v17, %v3304_v33  ;;  %v3305_v54 = vadd.f32 %v3226_v11, %v6656_v29 }
 0x23b   :  { %v4520_v18 = vpop.eup %4519 }
 0x23c   :  { %v4522_v46 = vpop.eup %4521  ;;  %v3501_v31 = vadd.f32 1.0, %v4520_v18  ;;  %v4077_v27 = vmul.f32 -1.442695, %v3349_v5  ;;  %v3350_v25 = vadd.f32 %v6470_v17, %v3305_v54 }
 0x23d   :  { %v4524_v7 = vpop.eup %4523  ;;  %3614 = vst [vmem:[%s6982_s3 + $0xb0] sm:$0xff] %v4522_v46 }
 0x23e   :  { %v4526_v14 = vpop.eup %4525  ;;  %4535 = vrcp.f32 %v3501_v31  ;;  %v3502_v8 = vadd.f32 1.0, %v4524_v7  ;;  %v3182_v35 = vpop.permute.xlu0 %3181  ;;  %v4078_v29 = vmul.f32 -1.442695, %v3350_v25 }
 0x23f   :  { %3615 = vst [vmem:[%s6982_s3 + $0xb8] sm:$0xff] %v4526_v14  ;;  %4537 = vpow2.f32 %v4077_v27  ;;  %v3227_v6 = vsel %vm3195_vm5, %v3180_v51, %v3182_v35 }
 0x240   :  { %4539 = vrcp.f32 %v3502_v8  ;;  %v3306_v23 = vadd.f32 %v3227_v6, %v6668_v19  ;;  %v3184_v0 = vpop.permute.xlu1 %3183 }
 0x241   :  { %4541 = vpow2.f32 %v4078_v29  ;;  %v3228_v12 = vsel %vm3195_vm5, %v3182_v35, %v3184_v0 }
 0x242   :  { %v3351_v4 = vadd.f32 %v6470_v17, %v3306_v23  ;;  %v3307_v36 = vadd.f32 %v3228_v12, %v6675_v38  ;;  %v4528_v44 = vpop.eup %4527 }
 0x243   :  { %v4530_v47 = vpop.eup %4529  ;;  %v3503_v63 = vadd.f32 1.0, %v4528_v44 }
 0x244   :  { %v4079_v56 = vmul.f32 -1.442695, %v3351_v4  ;;  %v3352_v22 = vadd.f32 %v6470_v17, %v3307_v36  ;;  %v4532_v43 = vpop.eup %4531  ;;  %3616 = vst [vmem:[%s6982_s3 + $0xc0] sm:$0xff] %v4530_v47 }
 0x245   :  { %v4534_v19 = vpop.eup %4533  ;;  %3617 = vst [vmem:[%s6982_s3 + $0xc8] sm:$0xff] %v4532_v43  ;;  %4543 = vrcp.f32 %v3503_v63  ;;  %v3186_v55 = vpop.permute.xlu0 %3185 }
 0x246   :  { %v4080_v53 = vmul.f32 -1.442695, %v3352_v22  ;;  %v3504_v38 = vadd.f32 1.0, %v4534_v19  ;;  %4545 = vpow2.f32 %v4079_v56  ;;  %v3229_v20 = vsel %vm3195_vm5, %v3184_v0, %v3186_v55 }
 0x247   :  { %v3308_v41 = vadd.f32 %v3229_v20, %v6688_v1  ;;  %v3188_v26 = vpop.permute.xlu1 %3187 }
 0x248   :  { %4547 = vpow2.f32 %v4080_v53  ;;  %v3230_v15 = vsel %vm3195_vm5, %v3186_v55, %v3188_v26 }
 0x249   :  { %4549 = vrcp.f32 %v3504_v38  ;;  %v3353_v59 = vadd.f32 %v6470_v17, %v3308_v41  ;;  %v3309_v58 = vadd.f32 %v3230_v15, %v6695_v30 }
 0x24b   :  { %v4536_v10 = vpop.eup %4535  ;;  %v4081_v28 = vmul.f32 -1.442695, %v3353_v59  ;;  %v3354_v32 = vadd.f32 %v6470_v17, %v3309_v58 }
 0x24c   :  { %v4538_v57 = vpop.eup %4537  ;;  %3618 = vst [vmem:[%s6982_s3 + $0xd0] sm:$0xff] %v4536_v10 }
 0x24d   :  { %v4540_v60 = vpop.eup %4539  ;;  %v3505_v39 = vadd.f32 1.0, %v4538_v57  ;;  %4551 = vpow2.f32 %v4081_v28  ;;  %v4082_v40 = vmul.f32 -1.442695, %v3354_v32 }
 0x24e   :  { %v4542_v1 = vpop.eup %4541  ;;  %3619 = vst [vmem:[%s6982_s3 + $0xd8] sm:$0xff] %v4540_v60  ;;  %v3190_v13 = vpop.permute.xlu0 %3189 }
 0x24f   :  { %4553 = vrcp.f32 %v3505_v39  ;;  %v3506_v30 = vadd.f32 1.0, %v4542_v1  ;;  %v3231_v16 = vsel %vm3195_vm5, %v3188_v26, %v3190_v13 }
 0x250   :  { %4555 = vpow2.f32 %v4082_v40  ;;  %v3310_v2 = vadd.f32 %v3231_v16, %v6708_v61  ;;  %v3192_v52 = vpop.permute.xlu1 %3191 }
 0x251   :  { %4557 = vrcp.f32 %v3506_v30  ;;  %v3232_v24 = vsel %vm3195_vm5, %v3190_v13, %v3192_v52 }
 0x252   :  { %v3355_v9 = vadd.f32 %v6470_v17, %v3310_v2  ;;  %v3311_v48 = vadd.f32 %v3232_v24, %v6715_v42  ;;  %v4544_v34 = vpop.eup %4543 }
 0x253   :  { %v3194_v45 = vpop.permute.xlu0 %3193  ;;  %v4546_v3 = vpop.eup %4545  ;;  %3620 = vst [vmem:[%s6982_s3 + $0xe0] sm:$0xff] %v4544_v34 }
 0x254   :  { %v4083_v50 = vmul.f32 -1.442695, %v3355_v9  ;;  %v3356_v49 = vadd.f32 %v6470_v17, %v3311_v48  ;;  %v3233_v61 = vsel %vm3195_vm5, %v3192_v52, %v3194_v45  ;;  %v3507_v21 = vadd.f32 1.0, %v4546_v3 }
 0x255   :  { %v4548_v62 = vpop.eup %4547  ;;  %v3312_v33 = vadd.f32 %v3233_v61, %v6722_v37 }
 0x256   :  { %v4550_v51 = vpop.eup %4549  ;;  %v3508_v11 = vadd.f32 1.0, %v4548_v62  ;;  %4559 = vpow2.f32 %v4083_v50  ;;  %v4084_v42 = vmul.f32 -1.442695, %v3356_v49 }
 0x257   :  { %3621 = vst [vmem:[%s6982_s3 + $0xe8] sm:$0xff] %v4550_v51  ;;  %4561 = vrcp.f32 %v3507_v21  ;;  %v3357_v18 = vadd.f32 %v6470_v17, %v3312_v33 }
 0x258   :  { %4563 = vrcp.f32 %v3508_v11 }
 0x259   :  { %4565 = vpow2.f32 %v4084_v42  ;;  %v4085_v5 = vmul.f32 -1.442695, %v3357_v18 }
 0x25a   :  { %v4552_v54 = vpop.eup %4551 }
 0x25b   :  { %4567 = vpow2.f32 %v4085_v5  ;;  %v3509_v31 = vadd.f32 1.0, %v4552_v54 }
 0x25c   :  { %v4554_v46 = vpop.eup %4553 }
 0x25d   :  { %v4556_v7 = vpop.eup %4555  ;;  %3622 = vst [vmem:[%s6982_s3 + $0xf0] sm:$0xff] %v4554_v46  ;;  %4569 = vrcp.f32 %v3509_v31 }
 0x25e   :  { %v4558_v37 = vpop.eup %4557  ;;  %v3510_v27 = vadd.f32 1.0, %v4556_v7 }
 0x25f   :  { %3623 = vst [vmem:[%s6982_s3 + $0xf8] sm:$0xff] %v4558_v37 }
 0x260   :  { %4571 = vrcp.f32 %v3510_v27 }
 0x263   :  { %v4560_v17 = vpop.eup %4559 }
 0x264   :  { %v4562_v25 = vpop.eup %4561  ;;  %v3511_v14 = vadd.f32 1.0, %v4560_v17 }
 0x265   :  { %v4564_v8 = vpop.eup %4563  ;;  %3624 = vst [vmem:[%s6982_s3 + $0x100] sm:$0xff] %v4562_v25 }
 0x266   :  { %v4566_v35 = vpop.eup %4565  ;;  %3625 = vst [vmem:[%s6982_s3 + $0x108] sm:$0xff] %v4564_v8  ;;  %4573 = vrcp.f32 %v3511_v14 }
 0x267   :  { %v3512_v29 = vadd.f32 1.0, %v4566_v35 }
 0x268   :  { %v4568_v6 = vpop.eup %4567 }
 0x269   :  { %4575 = vrcp.f32 %v3512_v29  ;;  %v3513_v23 = vadd.f32 1.0, %v4568_v6 }
 0x26a   :  { %v4570_v0 = vpop.eup %4569 }
 0x26b   :  { %4577 = vrcp.f32 %v3513_v23  ;;  %3626 = vst [vmem:[%s6982_s3 + $0x110] sm:$0xff] %v4570_v0 }
 0x26d   :  { %v4572_v12 = vpop.eup %4571 }
 0x26e   :  { %3627 = vst [vmem:[%s6982_s3 + $0x118] sm:$0xff] %v4572_v12 }
 0x273   :  { %v4574_v4 = vpop.eup %4573 }
 0x274   :  { %3628 = vst [vmem:[%s6982_s3 + $0x120] sm:$0xff] %v4574_v4 }
 0x276   :  { %v4576_v36 = vpop.eup %4575 }
 0x277   :  { %3629 = vst [vmem:[%s6982_s3 + $0x128] sm:$0xff] %v4576_v36 }
 0x278   :  { %v4578_v44 = vpop.eup %4577 }
 0x279   :  { %3631 = vst.msk [vmem:[%s6982_s3 + $0x130] sm:$0xff] %vm3630_vm8, %v4578_v44 }

</bundles_post_ra>
